<compile_context>
chip_gen: v7x
topology: tpu7x:2x2x1
jax: 0.10.0
libtpu: 0.0.40
codegen_flags: <defaults>
</compile_context>

<pallas_src>
import math
import functools

import jax
import jax.numpy as jnp
from jax.experimental import pallas as pl
from jax.experimental.pallas import tpu as pltpu

EPS = 1e-6


def lambda_init_fn(depth: int) -> float:
    return 0.8 - 0.6 * math.exp(-0.3 * depth)


def _rmsnorm(x, scale):
    # RMSNorm in fp32, matching the PyTorch reference (eps=1e-6).
    var = jnp.mean(x * x, axis=-1, keepdims=True)
    return x * jax.lax.rsqrt(var + EPS) * scale


# -----------------------------------------------------------------------------
# Fused Interpreter kernel.
#   grid = (batch_tile b [parallel], layer l [arbitrary], mlp chunk c [arbitrary])
#   o_ref (resident output block) doubles as the residual stream.
# -----------------------------------------------------------------------------
def interpreter_kernel(lam_ref, x_ref, cos_ref, sin_ref, mask_ref,
                       rms1_ref, wqkv_ref, wproj_ref, rmsh_ref, rms2_ref,
                       w1_ref, w3_ref, w2_ref, rmsout_ref,
                       o_ref, xn2_ref, attn_ref, *, n_head, h_dim):
    bt, T, D = o_ref.shape
    H = n_head
    hd = h_dim
    chd = 2 * hd
    half = hd // 2
    BT = bt * T
    NBH = H * bt                      # batched head count per differential branch

    layer = pl.program_id(1)
    n_layer = pl.num_programs(1)
    ck = pl.program_id(2)
    n_ck = pl.num_programs(2)

    # Residual stream initialized from the input once per batch tile.
    @pl.when(jnp.logical_and(layer == 0, ck == 0))
    def _init():
        o_ref[...] = x_ref[...]

    # per-layer scalars from SMEM
    lam_full = lam_ref[layer, 0]
    lam_init = lam_ref[layer, 1]

    # ---------------- attention branch + MLP pre-norm: once per (b, layer) ----
    @pl.when(ck == 0)
    def _attention():
        x = o_ref[...]                                    # (bt, T, D) fp32 residual
        cos = cos_ref[...]                                # (bt, T, hd) fp32
        sin = sin_ref[...]
        mask = mask_ref[...].astype(jnp.float32)          # (bt, T, T) additive

        # pre-norm + QKV projection: bf16 operands, fp32 accumulation.
        # q/k/v via lane-aligned weight slices -> no (BT, 3D) fp32 intermediate.
        xn = _rmsnorm(x, rms1_ref[0, 0]).reshape(BT, D).astype(jnp.bfloat16)
        q = jnp.dot(xn, wqkv_ref[0, :, 0:D],
                    preferred_element_type=jnp.float32).reshape(bt, T, D)
        k = jnp.dot(xn, wqkv_ref[0, :, D:2 * D],
                    preferred_element_type=jnp.float32).reshape(bt, T, D)
        v = jnp.dot(xn, wqkv_ref[0, :, 2 * D:3 * D],
                    preferred_element_type=jnp.float32)
        v = v.astype(jnp.bfloat16).reshape(bt, T, D)

        # head-major stacks via leading-axis stacking (no lane-dim transposes):
        #   q/k: (2H, bt, T, hd), v: (H*bt, T, 2*hd)
        q_h = jnp.stack([q[:, :, h * hd:(h + 1) * hd] for h in range(2 * H)], axis=0)
        k_h = jnp.stack([k[:, :, h * hd:(h + 1) * hd] for h in range(2 * H)], axis=0)
        v_h = jnp.stack([v[:, :, h * chd:(h + 1) * chd] for h in range(H)], axis=0)
        v_h = v_h.reshape(NBH, T, chd)

        # RoPE, applied ONCE per q/k stack (cos/sin broadcast over all heads).
        def rope(t):                                      # t: (2H, bt, T, hd) fp32
            if hd % 128 == 0:
                # lane-aligned head dim: XLU rotate (free slot) + sign vector
                sign = jnp.where(
                    jax.lax.broadcasted_iota(jnp.int32, (1, 1, 1, hd), 3) < half,
                    -1.0, 1.0)
                rot = pltpu.roll(t, shift=half, axis=3) * sign
            else:
                rot = jnp.concatenate([-t[..., half:], t[..., :half]], axis=-1)
            return t * cos[None] + rot * sin[None]

        q_h = rope(q_h).astype(jnp.bfloat16).reshape(2 * NBH, T, hd)
        k_h = rope(k_h).astype(jnp.bfloat16).reshape(2 * NBH, T, hd)

        inv_sqrt = 1.0 / math.sqrt(hd)

        def attend(qq, kk):                               # (NBH, T, hd) bf16 each
            s = jnp.einsum('ntd,nsd->nts', qq, kk,
                           preferred_element_type=jnp.float32) * inv_sqrt
            s = (s.reshape(H, bt, T, T) + mask[None]).reshape(NBH, T, T)
            m_max = jnp.max(s, axis=-1, keepdims=True)
            p = jnp.exp(s - m_max)
            p = p / jnp.sum(p, axis=-1, keepdims=True)    # exact softmax
            return jnp.einsum('nts,nsd->ntd', p.astype(jnp.bfloat16), v_h,
                              preferred_element_type=jnp.float32)   # (NBH, T, 2hd)

        o1 = attend(q_h[:NBH], k_h[:NBH])                 # differential branch 1
        o2 = attend(q_h[NBH:], k_h[NBH:])                 # differential branch 2
        oh = o1 - lam_full * o2                           # (NBH, T, 2hd) fp32
        oh = _rmsnorm(oh, rmsh_ref[0, 0])                 # single fused head-norm
        oh = oh.astype(jnp.bfloat16).reshape(H, bt, T, chd)

        # scatter per-head outputs into a lane-major (BT, D) bf16 slab
        for h in range(H):
            attn_ref[:, h * chd:(h + 1) * chd] = oh[h].reshape(BT, chd)

        # single full-width output projection; (1 - lambda_init) folded after it
        y = jnp.dot(attn_ref[...], wproj_ref[0],
                    preferred_element_type=jnp.float32).reshape(bt, T, D)
        x = x + (1.0 - lam_init) * y
        o_ref[...] = x

        # pre-norm MLP input staged once for all hidden-dim chunks
        xn2_ref[...] = _rmsnorm(x, rms2_ref[0, 0]).reshape(BT, D).astype(jnp.bfloat16)

    # ---------------- SwiGLU MLP: one hidden-dim chunk per grid step ----------
    xn2 = xn2_ref[...]                                    # (BT, D) bf16
    a = jnp.dot(xn2, w1_ref[0], preferred_element_type=jnp.float32)
    b = jnp.dot(xn2, w3_ref[0], preferred_element_type=jnp.float32)
    g = (jax.nn.silu(a) * b).astype(jnp.bfloat16)
    mlp = jnp.dot(g, w2_ref[0], preferred_element_type=jnp.float32)
    o_ref[...] = o_ref[...] + mlp.reshape(bt, T, D)

    @pl.when(jnp.logical_and(layer == n_layer - 1, ck == n_ck - 1))
    def _finalize():
        o_ref[...] = _rmsnorm(o_ref[...], rmsout_ref[0])


# -----------------------------------------------------------------------------
# Helpers: VMEM budget, MLP chunking, RoPE tables, parameters.
# -----------------------------------------------------------------------------
def _vmem_limit_bytes():
    # ~80% of physical VMEM: ~51 MiB on v7x (64 MiB), ~102 MiB on v5e/v6e (128 MiB).
    try:
        cap = int(pltpu.get_tpu_info().vmem_capacity_bytes)
        return max(32 * 1024 * 1024, int(cap * 0.8))
    except Exception:
        return 48 * 1024 * 1024


def _pick_hidden_chunk(hidden, max_chunk=2048):
    # Chunk must be a multiple of 128 dividing `hidden`, or the full hidden dim.
    if hidden <= max_chunk:
        return hidden
    for c in range(max_chunk, 0, -128):
        if hidden % c == 0:
            return c
    return hidden


def rope2d_cos_sin(positions, h_dim, base):
    # positions: (B, T, 2) int -- (row, col).  Returns (B, T, h_dim) tables.
    assert h_dim % 4 == 0, "assumed RoPE2D needs h_dim divisible by 4"
    quarter = h_dim // 4
    d_axis = h_dim // 2
    inv_freq = 1.0 / (base ** (jnp.arange(quarter, dtype=jnp.float32) * 2.0 / d_axis))
    row = positions[..., 0].astype(jnp.float32)
    col = positions[..., 1].astype(jnp.float32)
    ang = jnp.concatenate([row[..., None] * inv_freq,
                           col[..., None] * inv_freq], axis=-1)   # (B, T, hd//2)
    ang = jnp.concatenate([ang, ang], axis=-1)                    # (B, T, hd)
    return jnp.cos(ang), jnp.sin(ang)


def init_params(key, D, H, n_layer):
    hd = D // H // 2
    chd = 2 * hd
    hidden = 4 * D
    std = 0.02
    keys = jax.random.split(key, n_layer)
    rms1, wqkv, wproj, rmsh, rms2, w1, w3, w2, lam = ([] for _ in range(9))
    for d in range(n_layer):
        ks = jax.random.split(keys[d], 9)
        lq1 = 0.1 * jax.random.normal(ks[5], (hd,), jnp.float32)
        lk1 = 0.1 * jax.random.normal(ks[6], (hd,), jnp.float32)
        lq2 = 0.1 * jax.random.normal(ks[7], (hd,), jnp.float32)
        lk2 = 0.1 * jax.random.normal(ks[8], (hd,), jnp.float32)
        l_init = lambda_init_fn(d)
        # Frozen-inference assumption: lambda_full derived once from the
        # (would-be learnable) lambda parameters.
        l_full = (jnp.exp(jnp.sum(lq1 * lk1)) - jnp.exp(jnp.sum(lq2 * lk2))
                  + jnp.float32(l_init))
        lam.append(jnp.stack([l_full, jnp.float32(l_init)]))
        rms1.append(jnp.ones((1, D), jnp.float32))
        wqkv.append((std * jax.random.normal(ks[0], (D, 3 * D), jnp.float32)
                     ).astype(jnp.bfloat16))
        wproj.append((std * jax.random.normal(ks[1], (D, D), jnp.float32)
                      ).astype(jnp.bfloat16))
        rmsh.append(jnp.ones((1, chd), jnp.float32))
        rms2.append(jnp.ones((1, D), jnp.float32))
        w1.append((std * jax.random.normal(ks[2], (D, hidden), jnp.float32)
                   ).astype(jnp.bfloat16))
        w3.append((std * jax.random.normal(ks[3], (D, hidden), jnp.float32)
                   ).astype(jnp.bfloat16))
        w2.append((std * jax.random.normal(ks[4], (hidden, D), jnp.float32)
                   ).astype(jnp.bfloat16))
    return dict(
        lam=jnp.stack(lam),          # (L, 2) f32: [lambda_full, lambda_init]
        rms1=jnp.stack(rms1),        # (L, 1, D)
        wqkv=jnp.stack(wqkv),        # (L, D, 3D) bf16
        wproj=jnp.stack(wproj),      # (L, D, D)  bf16
        rmsh=jnp.stack(rmsh),        # (L, 1, 2*hd)
        rms2=jnp.stack(rms2),        # (L, 1, D)
        w1=jnp.stack(w1),            # (L, D, 4D) bf16
        w3=jnp.stack(w3),            # (L, D, 4D) bf16
        w2=jnp.stack(w2),            # (L, 4D, D) bf16
        rms_out=jnp.ones((1, D), jnp.float32),
    )


# -----------------------------------------------------------------------------
# Full forward (equivalent of Interpreter.forward with kv_cache=None).
# -----------------------------------------------------------------------------
def interpreter_forward(x, attn_mask, positions, params, *, n_head,
                        rope_base=10000, mlp_chunk=2048):
    B, T, D = x.shape
    hd = D // n_head // 2
    chd = 2 * hd
    hidden = params['w1'].shape[-1]
    L = params['lam'].shape[0]

    cos, sin = rope2d_cos_sin(positions, hd, rope_base)
    cos = cos.astype(jnp.float32)
    sin = sin.astype(jnp.float32)

    # squeeze PyTorch-style (B, 1, T, T) mask to (B, T, T); pass as bf16 additive
    if attn_mask.ndim == 4:
        attn_mask = attn_mask[:, 0]
    attn_mask = attn_mask.astype(jnp.bfloat16)

    # v7x has 2 TensorCores: give the leading 'parallel' batch axis 2 tiles when
    # possible (neutral on single-core v5e/v6e).
    n_bt = 2 if (B % 2 == 0) else 1
    bt = B // n_bt

    chunk = _pick_hidden_chunk(hidden, mlp_chunk)
    n_ck = hidden // chunk

    kernel = functools.partial(interpreter_kernel, n_head=n_head, h_dim=hd)

    in_specs = [
        pl.BlockSpec(memory_space=pltpu.MemorySpace.SMEM),               # lam (L,2)
        pl.BlockSpec((bt, T, D), lambda b, l, c: (b, 0, 0)),             # x
        pl.BlockSpec((bt, T, hd), lambda b, l, c: (b, 0, 0)),            # cos
        pl.BlockSpec((bt, T, hd), lambda b, l, c: (b, 0, 0)),            # sin
        pl.BlockSpec((bt, T, T), lambda b, l, c: (b, 0, 0)),             # attn mask
        pl.BlockSpec((1, 1, D), lambda b, l, c: (l, 0, 0)),              # rms1
        pl.BlockSpec((1, D, 3 * D), lambda b, l, c: (l, 0, 0)),          # wqkv
        pl.BlockSpec((1, D, D), lambda b, l, c: (l, 0, 0)),              # wproj
        pl.BlockSpec((1, 1, chd), lambda b, l, c: (l, 0, 0)),            # rms head
        pl.BlockSpec((1, 1, D), lambda b, l, c: (l, 0, 0)),              # rms2
        pl.BlockSpec((1, D, chunk), lambda b, l, c: (l, 0, c)),          # w1 chunk
        pl.BlockSpec((1, D, chunk), lambda b, l, c: (l, 0, c)),          # w3 chunk
        pl.BlockSpec((1, chunk, D), lambda b, l, c: (l, c, 0)),          # w2 chunk
        pl.BlockSpec((1, D), lambda b, l, c: (0, 0)),                    # rms_out
    ]
    out_spec = pl.BlockSpec((bt, T, D), lambda b, l, c: (b, 0, 0))

    return pl.pallas_call(
        kernel,
        out_shape=jax.ShapeDtypeStruct((B, T, D), jnp.float32),
        grid=(n_bt, L, n_ck),
        in_specs=in_specs,
        out_specs=out_spec,
        scratch_shapes=[pltpu.VMEM((bt * T, D), jnp.bfloat16),   # staged MLP input
                        pltpu.VMEM((bt * T, D), jnp.bfloat16)],  # attention head slab
        compiler_params=pltpu.CompilerParams(
            dimension_semantics=("parallel", "arbitrary", "arbitrary"),
            vmem_limit_bytes=_vmem_limit_bytes(),
        ),
    )(params['lam'], x, cos, sin, attn_mask,
      params['rms1'], params['wqkv'], params['wproj'], params['rmsh'],
      params['rms2'], params['w1'], params['w3'], params['w2'],
      params['rms_out'])


# -----------------------------------------------------------------------------
if __name__ == "__main__":
    # small shapes consistent with REPLConfig: n_dim=32, n_head=4, n_layer=2
    B, T, D, H, L = 2, 8, 32, 4, 2

    key = jax.random.PRNGKey(0)
    k_x, k_pos, k_params = jax.random.split(key, 3)

    x = jax.random.normal(k_x, (B, T, D), jnp.float32)
    positions = jax.random.randint(k_pos, (B, T, 2), 0, 60)   # (row, col) positions

    # causal additive float mask, PyTorch-broadcast shape (B, 1, T, T)
    causal = jnp.tril(jnp.ones((T, T), dtype=bool))
    attn_mask = jnp.where(causal, 0.0, -1e9).astype(jnp.float32)
    attn_mask = jnp.broadcast_to(attn_mask, (B, 1, T, T))

    params = init_params(k_params, D, H, L)

    out = interpreter_forward(x, attn_mask, positions, params, n_head=H)
    out = jax.block_until_ready(out)

    assert out.shape == (B, T, D)
    assert bool(jnp.isfinite(out).all())
    print("KERNEL_OK")
</pallas_src>

<mosaic_0001>
module attributes {stable_mosaic.version = 11 : i64} {
  func.func @interpreter_kernel(%arg0: i32, %arg1: i32, %arg2: i32, %arg3: memref<2x2xf32, #tpu.memory_space<smem>>, %arg4: memref<1x8x32xf32, #tpu.memory_space<vmem>>, %arg5: memref<1x8x4xf32, #tpu.memory_space<vmem>>, %arg6: memref<1x8x4xf32, #tpu.memory_space<vmem>>, %arg7: memref<1x8x8xbf16, #tpu.memory_space<vmem>>, %arg8: memref<1x1x32xf32, #tpu.memory_space<vmem>>, %arg9: memref<1x32x96xbf16, #tpu.memory_space<vmem>>, %arg10: memref<1x32x32xbf16, #tpu.memory_space<vmem>>, %arg11: memref<1x1x8xf32, #tpu.memory_space<vmem>>, %arg12: memref<1x1x32xf32, #tpu.memory_space<vmem>>, %arg13: memref<1x32x128xbf16, #tpu.memory_space<vmem>>, %arg14: memref<1x32x128xbf16, #tpu.memory_space<vmem>>, %arg15: memref<1x128x32xbf16, #tpu.memory_space<vmem>>, %arg16: memref<1x32xf32, #tpu.memory_space<vmem>>, %arg17: memref<1x8x32xf32, #tpu.memory_space<vmem>>, %arg18: memref<8x32xbf16, #tpu.memory_space<vmem>>, %arg19: memref<8x32xbf16, #tpu.memory_space<vmem>>) attributes {dimension_semantics = [#tpu.dimension_semantics<parallel>, #tpu.dimension_semantics<arbitrary>, #tpu.dimension_semantics<arbitrary>], iteration_bounds = array<i64: 2, 2, 1>, scalar_prefetch = 0 : i64, scratch_operands = 2 : i64, tpu.core_type = #tpu.core_type<tc>, window_params = [{transform_indices = @transform_0, window_bounds = array<i64: 2, 2>}, {transform_indices = @transform_1, window_bounds = array<i64: 1, 8, 32>}, {transform_indices = @transform_2, window_bounds = array<i64: 1, 8, 4>}, {transform_indices = @transform_3, window_bounds = array<i64: 1, 8, 4>}, {transform_indices = @transform_4, window_bounds = array<i64: 1, 8, 8>}, {transform_indices = @transform_5, window_bounds = array<i64: 1, 1, 32>}, {transform_indices = @transform_6, window_bounds = array<i64: 1, 32, 96>}, {transform_indices = @transform_7, window_bounds = array<i64: 1, 32, 32>}, {transform_indices = @transform_8, window_bounds = array<i64: 1, 1, 8>}, {transform_indices = @transform_9, window_bounds = array<i64: 1, 1, 32>}, {transform_indices = @transform_10, window_bounds = array<i64: 1, 32, 128>}, {transform_indices = @transform_11, window_bounds = array<i64: 1, 32, 128>}, {transform_indices = @transform_12, window_bounds = array<i64: 1, 128, 32>}, {pipeline_mode = #tpu.pipeline_mode<synchronous>, transform_indices = @transform_13, window_bounds = array<i64: 1, 32>}, {transform_indices = @transform_14, window_bounds = array<i64: 1, 8, 32>}]} {
    %c0_i32 = arith.constant 0 : i32
    %0 = arith.cmpi eq, %arg1, %c0_i32 : i32
    %c0_i32_0 = arith.constant 0 : i32
    %1 = arith.cmpi eq, %arg2, %c0_i32_0 : i32
    %2 = arith.andi %0, %1 : i1
    %3 = arith.extui %2 : i1 to i32
    %c0_i32_1 = arith.constant 0 : i32
    %4 = arith.cmpi ne, %3, %c0_i32_1 : i32
    scf.if %4 {
      %c0_26 = arith.constant 0 : index
      %c0_27 = arith.constant 0 : index
      %c0_28 = arith.constant 0 : index
      %39 = vector.load %arg4[%c0_26, %c0_27, %c0_28] : memref<1x8x32xf32, #tpu.memory_space<vmem>>, vector<1x8x32xf32>
      %c0_29 = arith.constant 0 : index
      %c0_30 = arith.constant 0 : index
      %c0_31 = arith.constant 0 : index
      %40 = vector.load %arg17[%c0_29, %c0_30, %c0_31] : memref<1x8x32xf32, #tpu.memory_space<vmem>>, vector<1x8x32xf32>
      tpu.vector_store %arg17[%c0_29, %c0_30, %c0_31], %39 {strides = array<i32>} : memref<1x8x32xf32, #tpu.memory_space<vmem>>, vector<1x8x32xf32>,
    } else {
    }
    %5 = arith.index_cast %arg1 : i32 to index
    %c0 = arith.constant 0 : index
    %6 = memref.load %arg3[%5, %c0] : memref<2x2xf32, #tpu.memory_space<smem>>
    %7 = arith.index_cast %arg1 : i32 to index
    %c1 = arith.constant 1 : index
    %8 = memref.load %arg3[%7, %c1] : memref<2x2xf32, #tpu.memory_space<smem>>
    %c0_i32_2 = arith.constant 0 : i32
    %9 = arith.cmpi eq, %arg2, %c0_i32_2 : i32
    %10 = arith.extui %9 : i1 to i32
    %c0_i32_3 = arith.constant 0 : i32
    %11 = arith.cmpi ne, %10, %c0_i32_3 : i32
    scf.if %11 {
      %c0_26 = arith.constant 0 : index
      %c0_27 = arith.constant 0 : index
      %c0_28 = arith.constant 0 : index
      %39 = vector.load %arg17[%c0_26, %c0_27, %c0_28] : memref<1x8x32xf32, #tpu.memory_space<vmem>>, vector<1x8x32xf32>
      %c0_29 = arith.constant 0 : index
      %c0_30 = arith.constant 0 : index
      %c0_31 = arith.constant 0 : index
      %40 = vector.load %arg5[%c0_29, %c0_30, %c0_31] : memref<1x8x4xf32, #tpu.memory_space<vmem>>, vector<1x8x4xf32>
      %c0_32 = arith.constant 0 : index
      %c0_33 = arith.constant 0 : index
      %c0_34 = arith.constant 0 : index
      %41 = vector.load %arg6[%c0_32, %c0_33, %c0_34] : memref<1x8x4xf32, #tpu.memory_space<vmem>>, vector<1x8x4xf32>
      %c0_35 = arith.constant 0 : index
      %c0_36 = arith.constant 0 : index
      %c0_37 = arith.constant 0 : index
      %42 = vector.load %arg7[%c0_35, %c0_36, %c0_37] : memref<1x8x8xbf16, #tpu.memory_space<vmem>>, vector<1x8x8xbf16>
      %43 = arith.extf %42 : vector<1x8x8xbf16> to vector<1x8x8xf32>
      %c0_38 = arith.constant 0 : index
      %c0_39 = arith.constant 0 : index
      %c0_40 = arith.constant 0 : index
      %44 = vector.load %arg8[%c0_38, %c0_39, %c0_40] : memref<1x1x32xf32, #tpu.memory_space<vmem>>, vector<1x1x32xf32>
      %45 = vector.shape_cast %44 : vector<1x1x32xf32> to vector<32xf32>
      %46 = arith.mulf %39, %39 : vector<1x8x32xf32>
      %cst_41 = arith.constant dense<0.000000e+00> : vector<1x8xf32>
      %47 = vector.multi_reduction <add>, %46, %cst_41 [2] : vector<1x8x32xf32> to vector<1x8xf32>
      %48 = vector.shape_cast %47 : vector<1x8xf32> to vector<1x8x1xf32>
      %cst_42 = arith.constant 3.200000e+01 : f32
      %49 = vector.broadcast %cst_42 : f32 to vector<1x8x1xf32>
      %50 = arith.divf %48, %49 : vector<1x8x1xf32>
      %cst_43 = arith.constant 9.99999997E-7 : f32
      %51 = vector.broadcast %cst_43 : f32 to vector<1x8x1xf32>
      %52 = arith.addf %50, %51 : vector<1x8x1xf32>
      %53 = math.rsqrt %52 : vector<1x8x1xf32>
      %54 = vector.broadcast %53 : vector<1x8x1xf32> to vector<1x8x32xf32>
      %55 = arith.mulf %39, %54 : vector<1x8x32xf32>
      %56 = vector.shape_cast %45 : vector<32xf32> to vector<1x1x32xf32>
      %57 = vector.broadcast %56 : vector<1x1x32xf32> to vector<1x8x32xf32>
      %58 = arith.mulf %55, %57 : vector<1x8x32xf32>
      %59 = vector.shape_cast %58 : vector<1x8x32xf32> to vector<8x32xf32>
      %60 = arith.truncf %59 : vector<8x32xf32> to vector<8x32xbf16>
      %c0_44 = arith.constant 0 : index
      %c0_45 = arith.constant 0 : index
      %c0_46 = arith.constant 0 : index
      %61 = vector.load %arg9[%c0_44, %c0_45, %c0_46] : memref<1x32x96xbf16, #tpu.memory_space<vmem>>, vector<1x32x32xbf16>
      %62 = vector.shape_cast %61 : vector<1x32x32xbf16> to vector<32x32xbf16>
      %cst_47 = arith.constant dense<0.000000e+00> : vector<8x32xf32>
      %63 = tpu.matmul %60, %62, %cst_47 {dimension_numbers = #tpu.dot_dimension_numbers<[1], [0], [0], [1], [0, 0, 1, 1], [], []>} : vector<8x32xbf16>, vector<32x32xbf16>, vector<8x32xf32> -> vector<8x32xf32>
      %64 = vector.shape_cast %63 : vector<8x32xf32> to vector<1x8x32xf32>
      %c0_48 = arith.constant 0 : index
      %c0_49 = arith.constant 0 : index
      %c32 = arith.constant 32 : index
      %65 = vector.load %arg9[%c0_48, %c0_49, %c32] : memref<1x32x96xbf16, #tpu.memory_space<vmem>>, vector<1x32x32xbf16>
      %66 = vector.shape_cast %65 : vector<1x32x32xbf16> to vector<32x32xbf16>
      %cst_50 = arith.constant dense<0.000000e+00> : vector<8x32xf32>
      %67 = tpu.matmul %60, %66, %cst_50 {dimension_numbers = #tpu.dot_dimension_numbers<[1], [0], [0], [1], [0, 0, 1, 1], [], []>} : vector<8x32xbf16>, vector<32x32xbf16>, vector<8x32xf32> -> vector<8x32xf32>
      %68 = vector.shape_cast %67 : vector<8x32xf32> to vector<1x8x32xf32>
      %c0_51 = arith.constant 0 : index
      %c0_52 = arith.constant 0 : index
      %c64 = arith.constant 64 : index
      %69 = vector.load %arg9[%c0_51, %c0_52, %c64] : memref<1x32x96xbf16, #tpu.memory_space<vmem>>, vector<1x32x32xbf16>
      %70 = vector.shape_cast %69 : vector<1x32x32xbf16> to vector<32x32xbf16>
      %cst_53 = arith.constant dense<0.000000e+00> : vector<8x32xf32>
      %71 = tpu.matmul %60, %70, %cst_53 {dimension_numbers = #tpu.dot_dimension_numbers<[1], [0], [0], [1], [0, 0, 1, 1], [], []>} : vector<8x32xbf16>, vector<32x32xbf16>, vector<8x32xf32> -> vector<8x32xf32>
      %72 = arith.truncf %71 : vector<8x32xf32> to vector<8x32xbf16>
      %73 = vector.shape_cast %72 : vector<8x32xbf16> to vector<1x8x32xbf16>
      %74 = vector.extract_strided_slice %64 {offsets = [0, 0, 0], sizes = [1, 8, 4], strides = [1, 1, 1]} : vector<1x8x32xf32> to vector<1x8x4xf32>
      %75 = vector.extract_strided_slice %64 {offsets = [0, 0, 4], sizes = [1, 8, 4], strides = [1, 1, 1]} : vector<1x8x32xf32> to vector<1x8x4xf32>
      %76 = vector.extract_strided_slice %64 {offsets = [0, 0, 8], sizes = [1, 8, 4], strides = [1, 1, 1]} : vector<1x8x32xf32> to vector<1x8x4xf32>
      %77 = vector.extract_strided_slice %64 {offsets = [0, 0, 12], sizes = [1, 8, 4], strides = [1, 1, 1]} : vector<1x8x32xf32> to vector<1x8x4xf32>
      %78 = vector.extract_strided_slice %64 {offsets = [0, 0, 16], sizes = [1, 8, 4], strides = [1, 1, 1]} : vector<1x8x32xf32> to vector<1x8x4xf32>
      %79 = vector.extract_strided_slice %64 {offsets = [0, 0, 20], sizes = [1, 8, 4], strides = [1, 1, 1]} : vector<1x8x32xf32> to vector<1x8x4xf32>
      %80 = vector.extract_strided_slice %64 {offsets = [0, 0, 24], sizes = [1, 8, 4], strides = [1, 1, 1]} : vector<1x8x32xf32> to vector<1x8x4xf32>
      %81 = vector.extract_strided_slice %64 {offsets = [0, 0, 28], sizes = [1, 8, 4], strides = [1, 1, 1]} : vector<1x8x32xf32> to vector<1x8x4xf32>
      %82 = vector.shape_cast %74 : vector<1x8x4xf32> to vector<1x1x8x4xf32>
      %83 = vector.shape_cast %75 : vector<1x8x4xf32> to vector<1x1x8x4xf32>
      %84 = vector.shape_cast %76 : vector<1x8x4xf32> to vector<1x1x8x4xf32>
      %85 = vector.shape_cast %77 : vector<1x8x4xf32> to vector<1x1x8x4xf32>
      %86 = vector.shape_cast %78 : vector<1x8x4xf32> to vector<1x1x8x4xf32>
      %87 = vector.shape_cast %79 : vector<1x8x4xf32> to vector<1x1x8x4xf32>
      %88 = vector.shape_cast %80 : vector<1x8x4xf32> to vector<1x1x8x4xf32>
      %89 = vector.shape_cast %81 : vector<1x8x4xf32> to vector<1x1x8x4xf32>
      %90 = tpu.concatenate %82, %83, %84, %85, %86, %87, %88, %89 in 0 : vector<1x1x8x4xf32>, vector<1x1x8x4xf32>, vector<1x1x8x4xf32>, vector<1x1x8x4xf32>, vector<1x1x8x4xf32>, vector<1x1x8x4xf32>, vector<1x1x8x4xf32>, vector<1x1x8x4xf32> -> vector<8x1x8x4xf32>
      %91 = vector.extract_strided_slice %68 {offsets = [0, 0, 0], sizes = [1, 8, 4], strides = [1, 1, 1]} : vector<1x8x32xf32> to vector<1x8x4xf32>
      %92 = vector.extract_strided_slice %68 {offsets = [0, 0, 4], sizes = [1, 8, 4], strides = [1, 1, 1]} : vector<1x8x32xf32> to vector<1x8x4xf32>
      %93 = vector.extract_strided_slice %68 {offsets = [0, 0, 8], sizes = [1, 8, 4], strides = [1, 1, 1]} : vector<1x8x32xf32> to vector<1x8x4xf32>
      %94 = vector.extract_strided_slice %68 {offsets = [0, 0, 12], sizes = [1, 8, 4], strides = [1, 1, 1]} : vector<1x8x32xf32> to vector<1x8x4xf32>
      %95 = vector.extract_strided_slice %68 {offsets = [0, 0, 16], sizes = [1, 8, 4], strides = [1, 1, 1]} : vector<1x8x32xf32> to vector<1x8x4xf32>
      %96 = vector.extract_strided_slice %68 {offsets = [0, 0, 20], sizes = [1, 8, 4], strides = [1, 1, 1]} : vector<1x8x32xf32> to vector<1x8x4xf32>
      %97 = vector.extract_strided_slice %68 {offsets = [0, 0, 24], sizes = [1, 8, 4], strides = [1, 1, 1]} : vector<1x8x32xf32> to vector<1x8x4xf32>
      %98 = vector.extract_strided_slice %68 {offsets = [0, 0, 28], sizes = [1, 8, 4], strides = [1, 1, 1]} : vector<1x8x32xf32> to vector<1x8x4xf32>
      %99 = vector.shape_cast %91 : vector<1x8x4xf32> to vector<1x1x8x4xf32>
      %100 = vector.shape_cast %92 : vector<1x8x4xf32> to vector<1x1x8x4xf32>
      %101 = vector.shape_cast %93 : vector<1x8x4xf32> to vector<1x1x8x4xf32>
      %102 = vector.shape_cast %94 : vector<1x8x4xf32> to vector<1x1x8x4xf32>
      %103 = vector.shape_cast %95 : vector<1x8x4xf32> to vector<1x1x8x4xf32>
      %104 = vector.shape_cast %96 : vector<1x8x4xf32> to vector<1x1x8x4xf32>
      %105 = vector.shape_cast %97 : vector<1x8x4xf32> to vector<1x1x8x4xf32>
      %106 = vector.shape_cast %98 : vector<1x8x4xf32> to vector<1x1x8x4xf32>
      %107 = tpu.concatenate %99, %100, %101, %102, %103, %104, %105, %106 in 0 : vector<1x1x8x4xf32>, vector<1x1x8x4xf32>, vector<1x1x8x4xf32>, vector<1x1x8x4xf32>, vector<1x1x8x4xf32>, vector<1x1x8x4xf32>, vector<1x1x8x4xf32>, vector<1x1x8x4xf32> -> vector<8x1x8x4xf32>
      %108 = vector.extract_strided_slice %73 {offsets = [0, 0, 0], sizes = [1, 8, 8], strides = [1, 1, 1]} : vector<1x8x32xbf16> to vector<1x8x8xbf16>
      %109 = vector.extract_strided_slice %73 {offsets = [0, 0, 8], sizes = [1, 8, 8], strides = [1, 1, 1]} : vector<1x8x32xbf16> to vector<1x8x8xbf16>
      %110 = vector.extract_strided_slice %73 {offsets = [0, 0, 16], sizes = [1, 8, 8], strides = [1, 1, 1]} : vector<1x8x32xbf16> to vector<1x8x8xbf16>
      %111 = vector.extract_strided_slice %73 {offsets = [0, 0, 24], sizes = [1, 8, 8], strides = [1, 1, 1]} : vector<1x8x32xbf16> to vector<1x8x8xbf16>
      %112 = vector.shape_cast %108 : vector<1x8x8xbf16> to vector<1x1x8x8xbf16>
      %113 = vector.shape_cast %109 : vector<1x8x8xbf16> to vector<1x1x8x8xbf16>
      %114 = vector.shape_cast %110 : vector<1x8x8xbf16> to vector<1x1x8x8xbf16>
      %115 = vector.shape_cast %111 : vector<1x8x8xbf16> to vector<1x1x8x8xbf16>
      %116 = tpu.concatenate %112, %113, %114, %115 in 0 : vector<1x1x8x8xbf16>, vector<1x1x8x8xbf16>, vector<1x1x8x8xbf16>, vector<1x1x8x8xbf16> -> vector<4x1x8x8xbf16>
      %117 = vector.shape_cast %116 : vector<4x1x8x8xbf16> to vector<4x8x8xbf16>
      %118 = vector.extract_strided_slice %90 {offsets = [0, 0, 0, 2], sizes = [8, 1, 8, 2], strides = [1, 1, 1, 1]} : vector<8x1x8x4xf32> to vector<8x1x8x2xf32>
      %cst_54 = arith.constant 0.000000e+00 : f32
      %119 = vector.broadcast %cst_54 : f32 to vector<8x1x8x2xf32>
      %120 = arith.subf %119, %118 : vector<8x1x8x2xf32>
      %121 = vector.extract_strided_slice %90 {offsets = [0, 0, 0, 0], sizes = [8, 1, 8, 2], strides = [1, 1, 1, 1]} : vector<8x1x8x4xf32> to vector<8x1x8x2xf32>
      %122 = tpu.concatenate %120, %121 in 3 : vector<8x1x8x2xf32>, vector<8x1x8x2xf32> -> vector<8x1x8x4xf32>
      %123 = vector.shape_cast %40 : vector<1x8x4xf32> to vector<1x1x8x4xf32>
      %124 = vector.broadcast %123 : vector<1x1x8x4xf32> to vector<8x1x8x4xf32>
      %125 = arith.mulf %90, %124 : vector<8x1x8x4xf32>
      %126 = vector.shape_cast %41 : vector<1x8x4xf32> to vector<1x1x8x4xf32>
      %127 = vector.broadcast %126 : vector<1x1x8x4xf32> to vector<8x1x8x4xf32>
      %128 = arith.mulf %122, %127 : vector<8x1x8x4xf32>
      %129 = arith.addf %125, %128 : vector<8x1x8x4xf32>
      %130 = arith.truncf %129 : vector<8x1x8x4xf32> to vector<8x1x8x4xbf16>
      %131 = vector.shape_cast %130 : vector<8x1x8x4xbf16> to vector<8x8x4xbf16>
      %132 = vector.extract_strided_slice %107 {offsets = [0, 0, 0, 2], sizes = [8, 1, 8, 2], strides = [1, 1, 1, 1]} : vector<8x1x8x4xf32> to vector<8x1x8x2xf32>
      %cst_55 = arith.constant 0.000000e+00 : f32
      %133 = vector.broadcast %cst_55 : f32 to vector<8x1x8x2xf32>
      %134 = arith.subf %133, %132 : vector<8x1x8x2xf32>
      %135 = vector.extract_strided_slice %107 {offsets = [0, 0, 0, 0], sizes = [8, 1, 8, 2], strides = [1, 1, 1, 1]} : vector<8x1x8x4xf32> to vector<8x1x8x2xf32>
      %136 = tpu.concatenate %134, %135 in 3 : vector<8x1x8x2xf32>, vector<8x1x8x2xf32> -> vector<8x1x8x4xf32>
      %137 = vector.shape_cast %40 : vector<1x8x4xf32> to vector<1x1x8x4xf32>
      %138 = vector.broadcast %137 : vector<1x1x8x4xf32> to vector<8x1x8x4xf32>
      %139 = arith.mulf %107, %138 : vector<8x1x8x4xf32>
      %140 = vector.shape_cast %41 : vector<1x8x4xf32> to vector<1x1x8x4xf32>
      %141 = vector.broadcast %140 : vector<1x1x8x4xf32> to vector<8x1x8x4xf32>
      %142 = arith.mulf %136, %141 : vector<8x1x8x4xf32>
      %143 = arith.addf %139, %142 : vector<8x1x8x4xf32>
      %144 = arith.truncf %143 : vector<8x1x8x4xf32> to vector<8x1x8x4xbf16>
      %145 = vector.shape_cast %144 : vector<8x1x8x4xbf16> to vector<8x8x4xbf16>
      %146 = vector.extract_strided_slice %131 {offsets = [0, 0, 0], sizes = [4, 8, 4], strides = [1, 1, 1]} : vector<8x8x4xbf16> to vector<4x8x4xbf16>
      %147 = vector.extract_strided_slice %145 {offsets = [0, 0, 0], sizes = [4, 8, 4], strides = [1, 1, 1]} : vector<8x8x4xbf16> to vector<4x8x4xbf16>
      "tpu.trace_start"() <{level = 10 : i32, message = "ntd,nsd->nts"}> : () -> ()
      %cst_56 = arith.constant dense<0.000000e+00> : vector<4x8x8xf32>
      %148 = tpu.matmul %146, %147, %cst_56 {dimension_numbers = #tpu.dot_dimension_numbers<[2], [2], [1], [1], [0, 0, 0, 1, 1, 1], [0], [0]>} : vector<4x8x4xbf16>, vector<4x8x4xbf16>, vector<4x8x8xf32> -> vector<4x8x8xf32>
      "tpu.trace_stop"() : () -> ()
      %cst_57 = arith.constant 5.000000e-01 : f32
      %149 = vector.broadcast %cst_57 : f32 to vector<4x8x8xf32>
      %150 = arith.mulf %148, %149 : vector<4x8x8xf32>
      %151 = vector.shape_cast %150 : vector<4x8x8xf32> to vector<4x1x8x8xf32>
      %152 = vector.shape_cast %43 : vector<1x8x8xf32> to vector<1x1x8x8xf32>
      %153 = vector.broadcast %152 : vector<1x1x8x8xf32> to vector<4x1x8x8xf32>
      %154 = arith.addf %151, %153 : vector<4x1x8x8xf32>
      %155 = vector.shape_cast %154 : vector<4x1x8x8xf32> to vector<4x8x8xf32>
      %cst_58 = arith.constant dense<0xFF800000> : vector<4x8xf32>
      %156 = vector.multi_reduction <maximumf>, %155, %cst_58 [2] : vector<4x8x8xf32> to vector<4x8xf32>
      %157 = vector.shape_cast %156 : vector<4x8xf32> to vector<4x8x1xf32>
      %158 = vector.broadcast %157 : vector<4x8x1xf32> to vector<4x8x8xf32>
      %159 = arith.subf %155, %158 : vector<4x8x8xf32>
      %160 = math.exp %159 : vector<4x8x8xf32>
      %cst_59 = arith.constant dense<0.000000e+00> : vector<4x8xf32>
      %161 = vector.multi_reduction <add>, %160, %cst_59 [2] : vector<4x8x8xf32> to vector<4x8xf32>
      %162 = vector.shape_cast %161 : vector<4x8xf32> to vector<4x8x1xf32>
      %163 = vector.broadcast %162 : vector<4x8x1xf32> to vector<4x8x8xf32>
      %164 = arith.divf %160, %163 : vector<4x8x8xf32>
      %165 = arith.truncf %164 : vector<4x8x8xf32> to vector<4x8x8xbf16>
      "tpu.trace_start"() <{level = 10 : i32, message = "nts,nsd->ntd"}> : () -> ()
      %cst_60 = arith.constant dense<0.000000e+00> : vector<4x8x8xf32>
      %166 = tpu.matmul %165, %117, %cst_60 {dimension_numbers = #tpu.dot_dimension_numbers<[2], [1], [1], [2], [0, 0, 0, 1, 1, 2], [0], [0]>} : vector<4x8x8xbf16>, vector<4x8x8xbf16>, vector<4x8x8xf32> -> vector<4x8x8xf32>
      "tpu.trace_stop"() : () -> ()
      %167 = vector.extract_strided_slice %131 {offsets = [4, 0, 0], sizes = [4, 8, 4], strides = [1, 1, 1]} : vector<8x8x4xbf16> to vector<4x8x4xbf16>
      %168 = vector.extract_strided_slice %145 {offsets = [4, 0, 0], sizes = [4, 8, 4], strides = [1, 1, 1]} : vector<8x8x4xbf16> to vector<4x8x4xbf16>
      "tpu.trace_start"() <{level = 10 : i32, message = "ntd,nsd->nts"}> : () -> ()
      %cst_61 = arith.constant dense<0.000000e+00> : vector<4x8x8xf32>
      %169 = tpu.matmul %167, %168, %cst_61 {dimension_numbers = #tpu.dot_dimension_numbers<[2], [2], [1], [1], [0, 0, 0, 1, 1, 1], [0], [0]>} : vector<4x8x4xbf16>, vector<4x8x4xbf16>, vector<4x8x8xf32> -> vector<4x8x8xf32>
      "tpu.trace_stop"() : () -> ()
      %cst_62 = arith.constant 5.000000e-01 : f32
      %170 = vector.broadcast %cst_62 : f32 to vector<4x8x8xf32>
      %171 = arith.mulf %169, %170 : vector<4x8x8xf32>
      %172 = vector.shape_cast %171 : vector<4x8x8xf32> to vector<4x1x8x8xf32>
      %173 = vector.shape_cast %43 : vector<1x8x8xf32> to vector<1x1x8x8xf32>
      %174 = vector.broadcast %173 : vector<1x1x8x8xf32> to vector<4x1x8x8xf32>
      %175 = arith.addf %172, %174 : vector<4x1x8x8xf32>
      %176 = vector.shape_cast %175 : vector<4x1x8x8xf32> to vector<4x8x8xf32>
      %cst_63 = arith.constant dense<0xFF800000> : vector<4x8xf32>
      %177 = vector.multi_reduction <maximumf>, %176, %cst_63 [2] : vector<4x8x8xf32> to vector<4x8xf32>
      %178 = vector.shape_cast %177 : vector<4x8xf32> to vector<4x8x1xf32>
      %179 = vector.broadcast %178 : vector<4x8x1xf32> to vector<4x8x8xf32>
      %180 = arith.subf %176, %179 : vector<4x8x8xf32>
      %181 = math.exp %180 : vector<4x8x8xf32>
      %cst_64 = arith.constant dense<0.000000e+00> : vector<4x8xf32>
      %182 = vector.multi_reduction <add>, %181, %cst_64 [2] : vector<4x8x8xf32> to vector<4x8xf32>
      %183 = vector.shape_cast %182 : vector<4x8xf32> to vector<4x8x1xf32>
      %184 = vector.broadcast %183 : vector<4x8x1xf32> to vector<4x8x8xf32>
      %185 = arith.divf %181, %184 : vector<4x8x8xf32>
      %186 = arith.truncf %185 : vector<4x8x8xf32> to vector<4x8x8xbf16>
      "tpu.trace_start"() <{level = 10 : i32, message = "nts,nsd->ntd"}> : () -> ()
      %cst_65 = arith.constant dense<0.000000e+00> : vector<4x8x8xf32>
      %187 = tpu.matmul %186, %117, %cst_65 {dimension_numbers = #tpu.dot_dimension_numbers<[2], [1], [1], [2], [0, 0, 0, 1, 1, 2], [0], [0]>} : vector<4x8x8xbf16>, vector<4x8x8xbf16>, vector<4x8x8xf32> -> vector<4x8x8xf32>
      "tpu.trace_stop"() : () -> ()
      %188 = vector.broadcast %6 : f32 to vector<4x8x8xf32>
      %189 = arith.mulf %188, %187 : vector<4x8x8xf32>
      %190 = arith.subf %166, %189 : vector<4x8x8xf32>
      %c0_66 = arith.constant 0 : index
      %c0_67 = arith.constant 0 : index
      %c0_68 = arith.constant 0 : index
      %191 = vector.load %arg11[%c0_66, %c0_67, %c0_68] : memref<1x1x8xf32, #tpu.memory_space<vmem>>, vector<1x1x8xf32>
      %192 = vector.shape_cast %191 : vector<1x1x8xf32> to vector<8xf32>
      %193 = arith.mulf %190, %190 : vector<4x8x8xf32>
      %cst_69 = arith.constant dense<0.000000e+00> : vector<4x8xf32>
      %194 = vector.multi_reduction <add>, %193, %cst_69 [2] : vector<4x8x8xf32> to vector<4x8xf32>
      %195 = vector.shape_cast %194 : vector<4x8xf32> to vector<4x8x1xf32>
      %cst_70 = arith.constant 8.000000e+00 : f32
      %196 = vector.broadcast %cst_70 : f32 to vector<4x8x1xf32>
      %197 = arith.divf %195, %196 : vector<4x8x1xf32>
      %cst_71 = arith.constant 9.99999997E-7 : f32
      %198 = vector.broadcast %cst_71 : f32 to vector<4x8x1xf32>
      %199 = arith.addf %197, %198 : vector<4x8x1xf32>
      %200 = math.rsqrt %199 : vector<4x8x1xf32>
      %201 = vector.broadcast %200 : vector<4x8x1xf32> to vector<4x8x8xf32>
      %202 = arith.mulf %190, %201 : vector<4x8x8xf32>
      %203 = vector.shape_cast %192 : vector<8xf32> to vector<1x1x8xf32>
      %204 = vector.broadcast %203 : vector<1x1x8xf32> to vector<4x8x8xf32>
      %205 = arith.mulf %202, %204 : vector<4x8x8xf32>
      %206 = arith.truncf %205 : vector<4x8x8xf32> to vector<4x8x8xbf16>
      %207 = vector.shape_cast %206 : vector<4x8x8xbf16> to vector<4x1x8x8xbf16>
      %208 = vector.extract_strided_slice %207 {offsets = [0, 0, 0, 0], sizes = [1, 1, 8, 8], strides = [1, 1, 1, 1]} : vector<4x1x8x8xbf16> to vector<1x1x8x8xbf16>
      %209 = vector.shape_cast %208 : vector<1x1x8x8xbf16> to vector<1x8x8xbf16>
      %210 = vector.shape_cast %209 : vector<1x8x8xbf16> to vector<8x8xbf16>
      %c0_72 = arith.constant 0 : index
      %c0_73 = arith.constant 0 : index
      %211 = vector.load %arg19[%c0_72, %c0_73] : memref<8x32xbf16, #tpu.memory_space<vmem>>, vector<8x8xbf16>
      tpu.vector_store %arg19[%c0_72, %c0_73], %210 {strides = array<i32>} : memref<8x32xbf16, #tpu.memory_space<vmem>>, vector<8x8xbf16>,
      %212 = vector.extract_strided_slice %207 {offsets = [1, 0, 0, 0], sizes = [1, 1, 8, 8], strides = [1, 1, 1, 1]} : vector<4x1x8x8xbf16> to vector<1x1x8x8xbf16>
      %213 = vector.shape_cast %212 : vector<1x1x8x8xbf16> to vector<1x8x8xbf16>
      %214 = vector.shape_cast %213 : vector<1x8x8xbf16> to vector<8x8xbf16>
      %c0_74 = arith.constant 0 : index
      %c8 = arith.constant 8 : index
      %215 = vector.load %arg19[%c0_74, %c8] : memref<8x32xbf16, #tpu.memory_space<vmem>>, vector<8x8xbf16>
      tpu.vector_store %arg19[%c0_74, %c8], %214 {strides = array<i32>} : memref<8x32xbf16, #tpu.memory_space<vmem>>, vector<8x8xbf16>,
      %216 = vector.extract_strided_slice %207 {offsets = [2, 0, 0, 0], sizes = [1, 1, 8, 8], strides = [1, 1, 1, 1]} : vector<4x1x8x8xbf16> to vector<1x1x8x8xbf16>
      %217 = vector.shape_cast %216 : vector<1x1x8x8xbf16> to vector<1x8x8xbf16>
      %218 = vector.shape_cast %217 : vector<1x8x8xbf16> to vector<8x8xbf16>
      %c0_75 = arith.constant 0 : index
      %c16 = arith.constant 16 : index
      %219 = vector.load %arg19[%c0_75, %c16] : memref<8x32xbf16, #tpu.memory_space<vmem>>, vector<8x8xbf16>
      tpu.vector_store %arg19[%c0_75, %c16], %218 {strides = array<i32>} : memref<8x32xbf16, #tpu.memory_space<vmem>>, vector<8x8xbf16>,
      %220 = vector.extract_strided_slice %207 {offsets = [3, 0, 0, 0], sizes = [1, 1, 8, 8], strides = [1, 1, 1, 1]} : vector<4x1x8x8xbf16> to vector<1x1x8x8xbf16>
      %221 = vector.shape_cast %220 : vector<1x1x8x8xbf16> to vector<1x8x8xbf16>
      %222 = vector.shape_cast %221 : vector<1x8x8xbf16> to vector<8x8xbf16>
      %c0_76 = arith.constant 0 : index
      %c24 = arith.constant 24 : index
      %223 = vector.load %arg19[%c0_76, %c24] : memref<8x32xbf16, #tpu.memory_space<vmem>>, vector<8x8xbf16>
      tpu.vector_store %arg19[%c0_76, %c24], %222 {strides = array<i32>} : memref<8x32xbf16, #tpu.memory_space<vmem>>, vector<8x8xbf16>,
      %c0_77 = arith.constant 0 : index
      %c0_78 = arith.constant 0 : index
      %224 = vector.load %arg19[%c0_77, %c0_78] : memref<8x32xbf16, #tpu.memory_space<vmem>>, vector<8x32xbf16>
      %c0_79 = arith.constant 0 : index
      %c0_80 = arith.constant 0 : index
      %c0_81 = arith.constant 0 : index
      %225 = vector.load %arg10[%c0_79, %c0_80, %c0_81] : memref<1x32x32xbf16, #tpu.memory_space<vmem>>, vector<1x32x32xbf16>
      %226 = vector.shape_cast %225 : vector<1x32x32xbf16> to vector<32x32xbf16>
      %cst_82 = arith.constant dense<0.000000e+00> : vector<8x32xf32>
      %227 = tpu.matmul %224, %226, %cst_82 {dimension_numbers = #tpu.dot_dimension_numbers<[1], [0], [0], [1], [0, 0, 1, 1], [], []>} : vector<8x32xbf16>, vector<32x32xbf16>, vector<8x32xf32> -> vector<8x32xf32>
      %228 = vector.shape_cast %227 : vector<8x32xf32> to vector<1x8x32xf32>
      %cst_83 = arith.constant 1.000000e+00 : f32
      %229 = arith.subf %cst_83, %8 : f32
      %230 = vector.broadcast %229 : f32 to vector<1x8x32xf32>
      %231 = arith.mulf %230, %228 : vector<1x8x32xf32>
      %232 = arith.addf %39, %231 : vector<1x8x32xf32>
      %c0_84 = arith.constant 0 : index
      %c0_85 = arith.constant 0 : index
      %c0_86 = arith.constant 0 : index
      %233 = vector.load %arg17[%c0_84, %c0_85, %c0_86] : memref<1x8x32xf32, #tpu.memory_space<vmem>>, vector<1x8x32xf32>
      tpu.vector_store %arg17[%c0_84, %c0_85, %c0_86], %232 {strides = array<i32>} : memref<1x8x32xf32, #tpu.memory_space<vmem>>, vector<1x8x32xf32>,
      %c0_87 = arith.constant 0 : index
      %c0_88 = arith.constant 0 : index
      %c0_89 = arith.constant 0 : index
      %234 = vector.load %arg12[%c0_87, %c0_88, %c0_89] : memref<1x1x32xf32, #tpu.memory_space<vmem>>, vector<1x1x32xf32>
      %235 = vector.shape_cast %234 : vector<1x1x32xf32> to vector<32xf32>
      %236 = arith.mulf %232, %232 : vector<1x8x32xf32>
      %cst_90 = arith.constant dense<0.000000e+00> : vector<1x8xf32>
      %237 = vector.multi_reduction <add>, %236, %cst_90 [2] : vector<1x8x32xf32> to vector<1x8xf32>
      %238 = vector.shape_cast %237 : vector<1x8xf32> to vector<1x8x1xf32>
      %cst_91 = arith.constant 3.200000e+01 : f32
      %239 = vector.broadcast %cst_91 : f32 to vector<1x8x1xf32>
      %240 = arith.divf %238, %239 : vector<1x8x1xf32>
      %cst_92 = arith.constant 9.99999997E-7 : f32
      %241 = vector.broadcast %cst_92 : f32 to vector<1x8x1xf32>
      %242 = arith.addf %240, %241 : vector<1x8x1xf32>
      %243 = math.rsqrt %242 : vector<1x8x1xf32>
      %244 = vector.broadcast %243 : vector<1x8x1xf32> to vector<1x8x32xf32>
      %245 = arith.mulf %232, %244 : vector<1x8x32xf32>
      %246 = vector.shape_cast %235 : vector<32xf32> to vector<1x1x32xf32>
      %247 = vector.broadcast %246 : vector<1x1x32xf32> to vector<1x8x32xf32>
      %248 = arith.mulf %245, %247 : vector<1x8x32xf32>
      %249 = vector.shape_cast %248 : vector<1x8x32xf32> to vector<8x32xf32>
      %250 = arith.truncf %249 : vector<8x32xf32> to vector<8x32xbf16>
      %c0_93 = arith.constant 0 : index
      %c0_94 = arith.constant 0 : index
      %251 = vector.load %arg18[%c0_93, %c0_94] : memref<8x32xbf16, #tpu.memory_space<vmem>>, vector<8x32xbf16>
      tpu.vector_store %arg18[%c0_93, %c0_94], %250 {strides = array<i32>} : memref<8x32xbf16, #tpu.memory_space<vmem>>, vector<8x32xbf16>,
    } else {
    }
    %c0_4 = arith.constant 0 : index
    %c0_5 = arith.constant 0 : index
    %12 = vector.load %arg18[%c0_4, %c0_5] : memref<8x32xbf16, #tpu.memory_space<vmem>>, vector<8x32xbf16>
    %c0_6 = arith.constant 0 : index
    %c0_7 = arith.constant 0 : index
    %c0_8 = arith.constant 0 : index
    %13 = vector.load %arg13[%c0_6, %c0_7, %c0_8] : memref<1x32x128xbf16, #tpu.memory_space<vmem>>, vector<1x32x128xbf16>
    %14 = vector.shape_cast %13 : vector<1x32x128xbf16> to vector<32x128xbf16>
    %cst = arith.constant dense<0.000000e+00> : vector<8x128xf32>
    %15 = tpu.matmul %12, %14, %cst {dimension_numbers = #tpu.dot_dimension_numbers<[1], [0], [0], [1], [0, 0, 1, 1], [], []>} : vector<8x32xbf16>, vector<32x128xbf16>, vector<8x128xf32> -> vector<8x128xf32>
    %c0_9 = arith.constant 0 : index
    %c0_10 = arith.constant 0 : index
    %c0_11 = arith.constant 0 : index
    %16 = vector.load %arg14[%c0_9, %c0_10, %c0_11] : memref<1x32x128xbf16, #tpu.memory_space<vmem>>, vector<1x32x128xbf16>
    %17 = vector.shape_cast %16 : vector<1x32x128xbf16> to vector<32x128xbf16>
    %cst_12 = arith.constant dense<0.000000e+00> : vector<8x128xf32>
    %18 = tpu.matmul %12, %17, %cst_12 {dimension_numbers = #tpu.dot_dimension_numbers<[1], [0], [0], [1], [0, 0, 1, 1], [], []>} : vector<8x32xbf16>, vector<32x128xbf16>, vector<8x128xf32> -> vector<8x128xf32>
    %19 = arith.negf %15 : vector<8x128xf32>
    %20 = math.exp %19 : vector<8x128xf32>
    %cst_13 = arith.constant 1.000000e+00 : f32
    %21 = vector.broadcast %cst_13 : f32 to vector<8x128xf32>
    %22 = arith.addf %21, %20 : vector<8x128xf32>
    %23 = arith.divf %21, %22 : vector<8x128xf32>
    %24 = arith.mulf %15, %23 : vector<8x128xf32>
    %25 = arith.mulf %24, %18 : vector<8x128xf32>
    %26 = arith.truncf %25 : vector<8x128xf32> to vector<8x128xbf16>
    %c0_14 = arith.constant 0 : index
    %c0_15 = arith.constant 0 : index
    %c0_16 = arith.constant 0 : index
    %27 = vector.load %arg15[%c0_14, %c0_15, %c0_16] : memref<1x128x32xbf16, #tpu.memory_space<vmem>>, vector<1x128x32xbf16>
    %28 = vector.shape_cast %27 : vector<1x128x32xbf16> to vector<128x32xbf16>
    %cst_17 = arith.constant dense<0.000000e+00> : vector<8x32xf32>
    %29 = tpu.matmul %26, %28, %cst_17 {dimension_numbers = #tpu.dot_dimension_numbers<[1], [0], [0], [1], [0, 0, 1, 1], [], []>} : vector<8x128xbf16>, vector<128x32xbf16>, vector<8x32xf32> -> vector<8x32xf32>
    %c0_18 = arith.constant 0 : index
    %c0_19 = arith.constant 0 : index
    %c0_20 = arith.constant 0 : index
    %30 = vector.load %arg17[%c0_18, %c0_19, %c0_20] : memref<1x8x32xf32, #tpu.memory_space<vmem>>, vector<1x8x32xf32>
    %31 = vector.shape_cast %29 : vector<8x32xf32> to vector<1x8x32xf32>
    %32 = arith.addf %30, %31 : vector<1x8x32xf32>
    %c0_21 = arith.constant 0 : index
    %c0_22 = arith.constant 0 : index
    %c0_23 = arith.constant 0 : index
    %33 = vector.load %arg17[%c0_21, %c0_22, %c0_23] : memref<1x8x32xf32, #tpu.memory_space<vmem>>, vector<1x8x32xf32>
    tpu.vector_store %arg17[%c0_21, %c0_22, %c0_23], %32 {strides = array<i32>} : memref<1x8x32xf32, #tpu.memory_space<vmem>>, vector<1x8x32xf32>,
    %c1_i32 = arith.constant 1 : i32
    %34 = arith.cmpi eq, %arg1, %c1_i32 : i32
    %c0_i32_24 = arith.constant 0 : i32
    %35 = arith.cmpi eq, %arg2, %c0_i32_24 : i32
    %36 = arith.andi %34, %35 : i1
    %37 = arith.extui %36 : i1 to i32
    %c0_i32_25 = arith.constant 0 : i32
    %38 = arith.cmpi ne, %37, %c0_i32_25 : i32
    scf.if %38 {
      %c0_26 = arith.constant 0 : index
      %c0_27 = arith.constant 0 : index
      %c0_28 = arith.constant 0 : index
      %39 = vector.load %arg17[%c0_26, %c0_27, %c0_28] : memref<1x8x32xf32, #tpu.memory_space<vmem>>, vector<1x8x32xf32>
      %c0_29 = arith.constant 0 : index
      %c0_30 = arith.constant 0 : index
      %40 = vector.load %arg16[%c0_29, %c0_30] : memref<1x32xf32, #tpu.memory_space<vmem>>, vector<1x32xf32>
      %41 = vector.shape_cast %40 : vector<1x32xf32> to vector<32xf32>
      %42 = arith.mulf %39, %39 : vector<1x8x32xf32>
      %cst_31 = arith.constant dense<0.000000e+00> : vector<1x8xf32>
      %43 = vector.multi_reduction <add>, %42, %cst_31 [2] : vector<1x8x32xf32> to vector<1x8xf32>
      %44 = vector.shape_cast %43 : vector<1x8xf32> to vector<1x8x1xf32>
      %cst_32 = arith.constant 3.200000e+01 : f32
      %45 = vector.broadcast %cst_32 : f32 to vector<1x8x1xf32>
      %46 = arith.divf %44, %45 : vector<1x8x1xf32>
      %cst_33 = arith.constant 9.99999997E-7 : f32
      %47 = vector.broadcast %cst_33 : f32 to vector<1x8x1xf32>
      %48 = arith.addf %46, %47 : vector<1x8x1xf32>
      %49 = math.rsqrt %48 : vector<1x8x1xf32>
      %50 = vector.broadcast %49 : vector<1x8x1xf32> to vector<1x8x32xf32>
      %51 = arith.mulf %39, %50 : vector<1x8x32xf32>
      %52 = vector.shape_cast %41 : vector<32xf32> to vector<1x1x32xf32>
      %53 = vector.broadcast %52 : vector<1x1x32xf32> to vector<1x8x32xf32>
      %54 = arith.mulf %51, %53 : vector<1x8x32xf32>
      %c0_34 = arith.constant 0 : index
      %c0_35 = arith.constant 0 : index
      %c0_36 = arith.constant 0 : index
      %55 = vector.load %arg17[%c0_34, %c0_35, %c0_36] : memref<1x8x32xf32, #tpu.memory_space<vmem>>, vector<1x8x32xf32>
      tpu.vector_store %arg17[%c0_34, %c0_35, %c0_36], %54 {strides = array<i32>} : memref<1x8x32xf32, #tpu.memory_space<vmem>>, vector<1x8x32xf32>,
    } else {
    }
    return
  }
  func.func @transform_0(%arg0: i32, %arg1: i32, %arg2: i32) -> (i32, i32) {
    %c0_i32 = arith.constant 0 : i32
    %c0_i32_0 = arith.constant 0 : i32
    %c0_i32_1 = arith.constant 0 : i32
    return %c0_i32, %c0_i32_0 : i32, i32
  }
  func.func @transform_1(%arg0: i32, %arg1: i32, %arg2: i32) -> (i32, i32, i32) {
    %c0_i32 = arith.constant 0 : i32
    %c0_i32_0 = arith.constant 0 : i32
    %c0_i32_1 = arith.constant 0 : i32
    return %arg0, %c0_i32, %c0_i32_0 : i32, i32, i32
  }
  func.func @transform_2(%arg0: i32, %arg1: i32, %arg2: i32) -> (i32, i32, i32) {
    %c0_i32 = arith.constant 0 : i32
    %c0_i32_0 = arith.constant 0 : i32
    %c0_i32_1 = arith.constant 0 : i32
    return %arg0, %c0_i32, %c0_i32_0 : i32, i32, i32
  }
  func.func @transform_3(%arg0: i32, %arg1: i32, %arg2: i32) -> (i32, i32, i32) {
    %c0_i32 = arith.constant 0 : i32
    %c0_i32_0 = arith.constant 0 : i32
    %c0_i32_1 = arith.constant 0 : i32
    return %arg0, %c0_i32, %c0_i32_0 : i32, i32, i32
  }
  func.func @transform_4(%arg0: i32, %arg1: i32, %arg2: i32) -> (i32, i32, i32) {
    %c0_i32 = arith.constant 0 : i32
    %c0_i32_0 = arith.constant 0 : i32
    %c0_i32_1 = arith.constant 0 : i32
    return %arg0, %c0_i32, %c0_i32_0 : i32, i32, i32
  }
  func.func @transform_5(%arg0: i32, %arg1: i32, %arg2: i32) -> (i32, i32, i32) {
    %c0_i32 = arith.constant 0 : i32
    %c0_i32_0 = arith.constant 0 : i32
    %c0_i32_1 = arith.constant 0 : i32
    return %arg1, %c0_i32, %c0_i32_0 : i32, i32, i32
  }
  func.func @transform_6(%arg0: i32, %arg1: i32, %arg2: i32) -> (i32, i32, i32) {
    %c0_i32 = arith.constant 0 : i32
    %c0_i32_0 = arith.constant 0 : i32
    %c0_i32_1 = arith.constant 0 : i32
    return %arg1, %c0_i32, %c0_i32_0 : i32, i32, i32
  }
  func.func @transform_7(%arg0: i32, %arg1: i32, %arg2: i32) -> (i32, i32, i32) {
    %c0_i32 = arith.constant 0 : i32
    %c0_i32_0 = arith.constant 0 : i32
    %c0_i32_1 = arith.constant 0 : i32
    return %arg1, %c0_i32, %c0_i32_0 : i32, i32, i32
  }
  func.func @transform_8(%arg0: i32, %arg1: i32, %arg2: i32) -> (i32, i32, i32) {
    %c0_i32 = arith.constant 0 : i32
    %c0_i32_0 = arith.constant 0 : i32
    %c0_i32_1 = arith.constant 0 : i32
    return %arg1, %c0_i32, %c0_i32_0 : i32, i32, i32
  }
  func.func @transform_9(%arg0: i32, %arg1: i32, %arg2: i32) -> (i32, i32, i32) {
    %c0_i32 = arith.constant 0 : i32
    %c0_i32_0 = arith.constant 0 : i32
    %c0_i32_1 = arith.constant 0 : i32
    return %arg1, %c0_i32, %c0_i32_0 : i32, i32, i32
  }
  func.func @transform_10(%arg0: i32, %arg1: i32, %arg2: i32) -> (i32, i32, i32) {
    %c0_i32 = arith.constant 0 : i32
    %c0_i32_0 = arith.constant 0 : i32
    return %arg1, %c0_i32, %arg2 : i32, i32, i32
  }
  func.func @transform_11(%arg0: i32, %arg1: i32, %arg2: i32) -> (i32, i32, i32) {
    %c0_i32 = arith.constant 0 : i32
    %c0_i32_0 = arith.constant 0 : i32
    return %arg1, %c0_i32, %arg2 : i32, i32, i32
  }
  func.func @transform_12(%arg0: i32, %arg1: i32, %arg2: i32) -> (i32, i32, i32) {
    %c0_i32 = arith.constant 0 : i32
    %c0_i32_0 = arith.constant 0 : i32
    return %arg1, %arg2, %c0_i32 : i32, i32, i32
  }
  func.func @transform_13(%arg0: i32, %arg1: i32, %arg2: i32) -> (i32, i32) {
    %c0_i32 = arith.constant 0 : i32
    %c0_i32_0 = arith.constant 0 : i32
    %c0_i32_1 = arith.constant 0 : i32
    return %c0_i32, %c0_i32_0 : i32, i32
  }
  func.func @transform_14(%arg0: i32, %arg1: i32, %arg2: i32) -> (i32, i32, i32) {
    %c0_i32 = arith.constant 0 : i32
    %c0_i32_0 = arith.constant 0 : i32
    %c0_i32_1 = arith.constant 0 : i32
    return %arg0, %c0_i32, %c0_i32_0 : i32, i32, i32
  }
}

</mosaic_0001>

<bundles_post_ra>
// kernel: tpu_custom_call.1
= control target key start
LH: loop header
LB: loop body
LE: loop exit
PB: predicated region body
PF: predicated region fallthrough
CT: control target
= control target key end

     0   :  { %s4010_s0 = inlined_call_operand.vmem [shape: f32[2,2], index: 0, kind: input, shape index: {}]   ;;  %s4011_s1 = inlined_call_operand.vmem [shape: f32[2,8,32], index: 1, kind: input, shape index: {}]   ;;  %s4012_s2 = inlined_call_operand.vmem [shape: f32[2,8,4], index: 2, kind: input, shape index: {}]   ;;  %s4013_s3 = inlined_call_operand.vmem [shape: f32[2,8,4], index: 3, kind: input, shape index: {}]   ;;  %s4014_s4 = inlined_call_operand.vmem [shape: bf16[2,8,8], index: 4, kind: input, shape index: {}]   ;;  %s4015_s5 = inlined_call_operand.vmem [shape: f32[2,1,32], index: 5, kind: input, shape index: {}]   ;;  %s4016_s6 = inlined_call_operand.vmem [shape: bf16[2,32,96], index: 6, kind: input, shape index: {}]   ;;  %s4017_s7 = inlined_call_operand.vmem [shape: bf16[2,32,32], index: 7, kind: input, shape index: {}]   ;;  %s4018_s8 = inlined_call_operand.vmem [shape: f32[2,1,8], index: 8, kind: input, shape index: {}]   ;;  %s4019_s9 = inlined_call_operand.vmem [shape: f32[2,1,32], index: 9, kind: input, shape index: {}]   ;;  %s4020_s10 = inlined_call_operand.vmem [shape: bf16[2,32,128], index: 10, kind: input, shape index: {}]   ;;  %s4021_s11 = inlined_call_operand.vmem [shape: bf16[2,32,128], index: 11, kind: input, shape index: {}]   ;;  %s4022_s12 = inlined_call_operand.vmem [shape: bf16[2,128,32], index: 12, kind: input, shape index: {}]   ;;  %s4023_s13 = inlined_call_operand.vmem [shape: f32[1,32], index: 13, kind: input, shape index: {}]   ;;  %s4024_s14 = inlined_call_operand.hbm [shape: f32[2,8,32], index: 14, kind: output, shape index: {}]  }
   0x1   :  { %4041 = sst [smem:[#allocation23_spill]] %s4010_s0 }
   0x2   :  { %4042 = sst [smem:[#allocation24_spill]] %s4011_s1 }
   0x3   :  { %4043 = sst [smem:[#allocation25_spill]] %s4014_s4 }
   0x4   :  { %4044 = sst [smem:[#allocation26_spill]] %s4016_s6 }
   0x5   :  { %4045 = sst [smem:[#allocation27_spill]] %s4017_s7 }
   0x6   :  { %4046 = sst [smem:[#allocation28_spill]] %s4022_s12 }
   0x7   :  { %4047 = sst [smem:[#allocation29_spill]] %s4023_s13 }
   0x8   :  { %4048 = sst [smem:[#allocation30_spill]] %s4024_s14 }
   0x9   :  { %19 = vsyncpa [#allocation6], 0 }
   0xa   :  { %20 = vsyncpa [#allocation5], 0 }
   0xb   :  { %22 = vsyncpa [#allocation5 + $0x1], 0  ;;  %s3364_s29 = smov 0   ;;  %s3366_s30 = smov 0  }
   0xc   :  { %s3368_s15 = smov 0   ;;  %s3370_s16 = smov 0  }
   0xd   :  { %s3372_s17 = smov 0   ;;  %s3374_s18 = smov 0  }
   0xe   :  { %s3376_s19 = smov 0   ;;  %s3378_s20 = smov 0  }
   0xf LB: > { %4049 = sst [smem:[#allocation10_spill]] %s3241_s29  ;;  %s2683_s21 = sadd.s32 4294967295, %s3269_s20   ;;  %s3269_s20 = sphi %s3378_s20, %s28_s20   ;;  %s3265_s19 = sphi %s3376_s19, %s4094_s19   ;;  %s3261_s18 = sphi %s3374_s18, %s4093_s18   ;;  %s3257_s17 = sphi %s3372_s17, %s4092_s17   ;;  %s3253_s16 = sphi %s3370_s16, %s4091_s16   ;;  %s3249_s15 = sphi %s3368_s15, %s4090_s15   ;;  %s3245_s30 = sphi %s3366_s30, %s4089_s30   ;;  %s3241_s29 = sphi %s3364_s29, %s4088_s29  }
  0x10   : > { %4050 = sst [smem:[#allocation11_spill]] %s3245_s30  ;;  %s2684_s22 = sadd.s32 4294967294, %s3269_s20  }
  0x11   : > { %4051 = sst [smem:[#allocation12_spill]] %s3249_s15  ;;  %s43_s23 = sadd.s32 1, %s3261_s18 }
  0x12   : > { %4052 = sst [smem:[#allocation13_spill]] %s3253_s16  ;;  %s47_s24 = sadd.s32 1, %s3265_s19 }
  0x13   : > { %4053 = sst [smem:[#allocation14_spill]] %s3257_s17  ;;  %p45_p0 = scmp.ge.s32.totalorder %s43_s23, 2 }
  0x14   : > { %4054 = sst [smem:[#allocation15_spill]] %s3261_s18  ;;  %s414_s25 = sadd.s32 1, %s3249_s15 }
  0x15   : > { %4055 = sst [smem:[#allocation16_spill]] %s3265_s19  ;;  %p424_p1 = scmp.ne.s32.totalorder %s3249_s15, %s3245_s30 }
  0x16   : > { %4056 = sst [smem:[#allocation17_spill]] %s3269_s20  ;;  %p425_p2 = scmp.eq.s32.totalorder %s2683_s21, 3 }
  0x17   : > { %s4096_s23 = smov (%p45_p0, %s43_s23), 0  ;;  %s4098_s24 = smov (!%p45_p0, %s47_s24), %s3265_s19 }
  0x18   : > { %4057 = sst [smem:[#allocation18_spill]] %s4096_s23  ;;  %p3414_p3 = por %p425_p2, %p424_p1 }
  0x19   : > { %p430_p4 = scmp.ne.s32.totalorder %s3245_s30, %s3241_s29  ;;  %p49_p5 = scmp.ge.s32.totalorder %s4098_s24, 2 }
  0x1a   : > { %s4058_s26 = scalar_select %p3414_p3, 1, 0 }
  0x1b   : > { %p431_p6 = scmp.eq.s32.totalorder %s2684_s22, 3  ;;  %p2685_p7 = scmp.ge.s32.totalorder %s3269_s20, 1 }
  0x1c   : > { %4059 = sst [smem:[#allocation19_spill]] %s4058_s26  ;;  %p438_p8 = scmp.lt.s32.totalorder %s3269_s20, 5 }
  0x1d   : > { %s4100_s24 = smov (%p49_p5, %s4098_s24), 0  ;;  %p3424_p9 = por %p431_p6, %p430_p4 }
  0x1e   : > { %4060 = sst [smem:[#allocation20_spill]] %s4100_s24  ;;  %p3428_p10 = pnand %p2685_p7, %p438_p8 }
  0x1f   : > { %s4061_s27 = scalar_select %p3424_p9, 1, 0 }
  0x20   : > { %s411_s23 = ssub.s32 %s3265_s19, %s4100_s24  ;;  %p2997_p12 = pneg %p3428_p10 }
  0x21   : > { %4062 = sst [smem:[#allocation21_spill]] %s4061_s27  ;;  %p412_p11 = scmp.eq.s32.totalorder %s411_s23, 0 }
  0x22   : > { %p3436_p13 = scmp.eq.s32.totalorder %s2683_s21, 0  ;;  %s4065_s0 = sld [smem:[#allocation23_spill]] }
  0x23   : > { %s3444_s14 = scalar_select %p412_p11, %s3249_s15, %s414_s25  }
  0x24   : > { %p2998_p0 = pnand %p3436_p13, %p2997_p12 }
  0x25   : > { %4066 = sst [smem:[#allocation22_spill]] %s3444_s14 }
  0x26   : > { %p3158_p2 = pneg %p2998_p0 }
  0x28   : > { %s451_s20 = sshll.u32 %s4065_s0, 4  ;;  %s452_s20 = int_to_ptr.vmem [resolvable:$true] %s451_s20 }
  0x29   : > { %s3156_s27 = scalar_lea.vmem %s452_s20, 32  ;;  %p3164_p6 = scmp.lt.s32.totalorder %s452_s20, %s452_s20 }
  0x2a   : > { %p3157_p1 = scmp.ne.s32.totalorder %s452_s20, %s3156_s27  ;;  %p3165_p7 = scmp.lt.s32.totalorder %s3156_s27, %s3156_s27 }
  0x2c   : > { %p3159_p4 = pnand %p3158_p2, %p3157_p1  ;;  %p3166_p8 = por %p3165_p7, %p3164_p6 }
  0x2e   : > { %p3160_p5 = pneg %p3159_p4 }
  0x30   : > { %p3167_p9 = pnand %p3166_p8, %p3160_p5 }
  0x32   : > { %3170 = shalt.err (!%p3167_p9)
}
  0x33   : > { %s3271_s21 = smov [#allocation4]   ;;  %564 = sbr.rel (%p3428_p10) target bundleno = 3529 (0xdc9), region = 76 }
  0x34   : > { %3000 = dma.vmem_to_smem (!%p2998_p0), %s452_s20, 32, %s3271_s21, [#allocation6]  }
  0x3a   : > { %3232 = dma.done.wait (%p3436_p13), [#allocation6], 32  }
  0x3b   : > { %3234 = vsyncadd (%p3436_p13), [#allocation6], 4294967264 }
  0x3c   : > { %570 = sfence }
  0x3d   : > { %s4031_s29 = sand.u32 1, %s3245_s30   ;;  %p666_p9 = scmp.lt.s32.totalorder %s3257_s17, 1 }
  0x3e   : > { %s2690_s18 = sshll.u32 %s4031_s29, 3  ;;  %p682_p11 = scmp.lt.s32.totalorder %s3253_s16, 1 }
  0x3f   : > { %p728_p10 = scmp.eq.s32.totalorder %s3253_s16, 0  ;;  %s4067_s1 = sld [smem:[#allocation24_spill]] }
  0x40   : > { %s667_s20 = scalar_select %p666_p9, %s3257_s17, 1 }
  0x41   : > { %s3462_s23 = scalar_select %p682_p11, %s3253_s16, 1 }
  0x42   : > { %s3464_s25 = sshll.u32 %s667_s20, 3  ;;  %s2694_s27 = sshll.u32 %s667_s20, 2  ;;  %vm735_vm0 = vcmask (%p728_p10), 261120  }
  0x43   : > { %s4068_s4 = sld [smem:[#allocation25_spill]]  ;;  %s2758_s12 = sshll.u32 %s3462_s23, 4 }
  0x44   : > { %s4069_s6 = sld [smem:[#allocation26_spill]]  ;;  %s4070_s7 = sld [smem:[#allocation27_spill]] }
  0x45   : > { %s669_s21 = scalar_lea.vmem %s4067_s1, %s3464_s25  ;;  %s697_s30 = scalar_lea.vmem %s4018_s8, %s3462_s23 }
  0x46   : > { %s700_s15 = scalar_lea.vmem %s4019_s9, %s3462_s23  ;;  %s3507_s20 = scalar_lea.vmem %s4020_s10, %s2758_s12  ;;  %v734_v0 = vld [vmem:[%s669_s21] sm:$0xff] (%p728_p10) }
  0x47   : > { %s2762_s0 = sshll.u32 %s3462_s23, 6  ;;  %s3520_s19 = scalar_lea.vmem [#allocation7], %s2690_s18 }
  0x48   : > { %736 = vst.msk [vmem:[%s3520_s19] sm:$0xff] (%p728_p10), %vm735_vm0, %v734_v0 }
  0x49   : > { %s3481_s17 = scalar_lea.vmem %s4068_s4, %s2694_s27  ;;  %s3512_s4 = scalar_lea.vmem %s4021_s11, %s2758_s12 }
  0x4a   : > { %s689_s1 = scalar_lea.vmem %s4069_s6, %s2758_s12  ;;  %s3494_s24 = scalar_lea.vmem %s4070_s7, %s2758_s12 }
  0x4b   : > { %s4071_s7 = sld [smem:[#allocation28_spill]]  ;;  %733 = sbr.rel (!%p728_p10) target bundleno = 82 (0x52), region = 84 }
  0x51   : > { %s3518_s14 = scalar_lea.vmem %s4071_s7, %s2762_s0 }
  0x52 PF: > { %v744_v1 = vld [vmem:[%s3520_s19] sm:$0xff]  ;;  %vm751_vm1 = vcmask 261120   ;;  %s3272_s6 = smov 96   ;;  %v3089_v5 = vld [vmem:[%s689_s1] sm:$0xff]   ;;  %v3273_v6 = vmov 0.0   ;;  %vm3274_vm2 = vmmov 0   ;;  %s4073_s18 = scalar_lea.vmem %s4015_s5, %s3462_s23 }
  0x53   : > { %v750_v2 = vmul.f32 %v744_v1, %v744_v1  ;;  %v3090_v3 = vld [vmem:[%s689_s1 + $0x8] sm:$0xff]   ;;  %2827 = vmatprep.subr.bf16.mxu1 %v3273_v6  ;;  %2831 = vmatprep.mubr.msk.bf16.mxu1 %vm3274_vm2, %v3273_v6  ;;  %s3275_s1 = smov 64   ;;  %v2707_v11 = vld [vmem:[%s4073_s18] ss:$0 sm:$0xff]  ;;  %s3276_s21 = smov 124   ;;  %vm1035_vm3 = vcmask 15360  }
  0x54   : > { %829 = vrot.lane.b32.xlu1 %v3090_v3, %s3272_s6  ;;  %2828 = vmatpush3.bf16.msra.mxu1 %v3089_v5  ;;  %s3277_s27 = smov 126   ;;  %s3278_s13 = smov 120   ;;  %vm1180_vm4 = vcmask 31744   ;;  %vm1425_vm5 = vcmask 1043456   ;;  %vm1373_vm6 = vcmask 64512   ;;  %vm2076_vm7 = vcmask 60416  }
  0x55   : > { %v752_v4 = vsel %vm751_vm1, %v750_v2, 0.0  ;;  %2857 = vmatprep.subr.bf16.mxu0 %v3273_v6  ;;  %2829 = vmatprep.subr.bf16.mxu1 %v3273_v6  ;;  %s3279_s16 = smov 116   ;;  %s3280_s28 = smov 2   ;;  %vm2084_vm8 = vcmask 126016   ;;  %vm2092_vm9 = vcmask 191616   ;;  %vm2100_vm10 = vcmask 257216  }
  0x56   : > { %753 = vadd.xlane.f32.xlu0 %v752_v4  ;;  %2859 = vmatprep.mubr.msk.bf16.mxu0 %vm3274_vm2, %v3273_v6  ;;  %s3281_s22 = smov 112   ;;  %s3282_s0 = smov 108   ;;  %vm2184_vm11 = vcmask 257024  }
  0x57   : > { %s4075_s12 = scalar_lea.vmem %s4013_s3, %s3464_s25  ;;  %s4076_s18 = sld [smem:[#allocation13_spill]] }
  0x58   : > { %2830 = vmatpush3.bf16.msra.mxu1 %v3090_v3  ;;  %v3624_v46 = vld [vmem:[%s4075_s12] sm:$0xff] }
  0x59   : > { %2835 = vmatprep.subr.bf16.mxu1 %v3273_v6 }
  0x5d   : > { %p2419_p12 = scmp.eq.s32.totalorder %s4076_s18, 1 }
  0x5e   : > { %s4077_s23 = sld [smem:[#allocation29_spill]] (%p2419_p12) }
  0x6c   : > { %827 = vrot.lane.b32.xlu0 %v3089_v5, %s3272_s6  ;;  %s4074_s6 = scalar_lea.vmem %s4012_s2, %s3464_s25  ;;  %s3283_s25 = smov 104  }
  0x6d   : > { %v3617_v45 = vld [vmem:[%s4074_s6] sm:$0xff] }
  0x70   : > { %873 = vrot.lane.b32.xlu0 %v3089_v5, %s3275_s1 }
  0xc6   : > { %v830_v16 = vpop.permute.xlu1 %829 }
  0xe3   : > { %v754_v7 = vpop.xlane.xlu0 %753 }
  0xe4   : > { %v756_v8 = vmul.f32 0.03125, %v754_v7 }
  0xe6   : > { %v757_v9 = vadd.f32 1e-06, %v756_v8 }
  0xe7   : > { %v828_v14 = vpop.permute.xlu0 %827 }
  0xe8   : > { %3105 = vrsqrt.f32 %v757_v9 }
  0xeb   : > { %v874_v17 = vpop.permute.xlu0 %873 }
  0xf2   : > { %v3106_v10 = vpop.eup %3105 }
  0xf3   : > { %v759_v12 = vmul.f32 %v3106_v10, %v744_v1 }
  0xf5   : > { %v766_v13 = vmul.f32 %v2707_v11, %v759_v12 }
  0xf7   : > { %v3541_v15 = vpack.c.bf16 %v766_v13, %v766_v13 }
  0xf9   : > { %2832 = vmatmul.mubr.msk.bf16.vlgmr.msra.gmra.mrb[0].mxu1 %vm751_vm1, %v3541_v15 }
  0xfa   : > { %2836 = vmatpush3.bf16.msra.mxu1 %v828_v14  ;;  %2839 = vmatprep.mubr.msk.bf16.mxu1 %vm3274_vm2, %v3273_v6 }
  0xfb   : > { %2837 = vmatprep.subr.bf16.mxu1 %v3273_v6 }
  0xfe   : > { %2838 = vmatpush3.bf16.msra.mxu1 %v830_v16 }
  0xff   : > { %2843 = vmatprep.subr.bf16.mxu1 %v3273_v6 }
 0x101   : > { %2840 = vmatmul.mubr.msk.bf16.vlgmr.msra.gmra.mrb[4].mxu1 %vm751_vm1, %v3541_v15 }
 0x102   : > { %2847 = vmatprep.mubr.msk.bf16.mxu1 %vm3274_vm2, %v3273_v6  ;;  %2844 = vmatpush3.bf16.msra.mxu1 %v874_v17 }
 0x103   : > { %2845 = vmatprep.subr.bf16.mxu1 %v3273_v6 }
 0x1cc   : > { %v3554_v18 = vpop.f32.mrb[0].mxu1 }
 0x1cd   : > { %921 = vrot.lane.b32.xlu1 %v3554_v18, %s3276_s21  ;;  %v2833_v19 = vpop.f32.mrb[1].mxu1  ;;  %v971_v20 = vsub.f32 0.0, %v3554_v18  ;;  %v1044_v54 = vmul.f32 %v3554_v18, %v3617_v45 }
 0x1ce   : > { %v824_v21 = vpop.f32.mrb[2].mxu1 }
 0x1cf   : > { %987 = vrot.lane.b32.xlu0 %v971_v20, %s3277_s27  ;;  %v2834_v22 = vpop.f32.mrb[3].mxu1 }
 0x1d4   : > { %v3559_v23 = vpop.f32.mrb[4].mxu1 }
 0x1d5   : > { %943 = vrot.lane.b32.xlu1 %v3559_v23, %s3276_s21  ;;  %v2841_v24 = vpop.f32.mrb[5].mxu1  ;;  %v1076_v25 = vsub.f32 0.0, %v3559_v23  ;;  %v1148_v48 = vmul.f32 %v3559_v23, %v3617_v45  ;;  %s2706_s21 = sshll.u32 %s4076_s18, 7 }
 0x1d6   : > { %v870_v26 = vpop.f32.mrb[6].mxu1 }
 0x1d7   : > { %1092 = vrot.lane.b32.xlu0 %v1076_v25, %s3277_s27  ;;  %v2842_v27 = vpop.f32.mrb[7].mxu1 }
 0x1d9   : > { %946 = vrot.lane.b32.xlu1 %v3559_v23, %s3278_s13 }
 0x1dd   : > { %949 = vrot.lane.b32.xlu1 %v3559_v23, %s3279_s16 }
 0x1e1   : > { %924 = vrot.lane.b32.xlu1 %v3554_v18, %s3278_s13 }
 0x1e5   : > { %927 = vrot.lane.b32.xlu1 %v3554_v18, %s3279_s16 }
 0x1e9   : > { %875 = vrot.lane.b32.xlu1 %v3090_v3, %s3275_s1 }
 0x1ed   : > { %1011 = vrot.lane.b32.xlu1 %v3554_v18, %s3280_s28 }
 0x1f1   : > { %1116 = vrot.lane.b32.xlu1 %v3559_v23, %s3280_s28 }
 0x23f   : > { %v3575_v28 = vpop.permute.xlu1 %921 }
 0x240   : > { %v972_v29 = vsub.f32 0.0, %v3575_v28  ;;  %1013 = vrot.lane.b32.xlu1 %v3575_v28, %s3280_s28  ;;  %v1045_v12 = vmul.f32 %v3575_v28, %v3617_v45 }
 0x241   : > { %v988_v41 = vpop.permute.xlu0 %987 }
 0x242   : > { %989 = vrot.lane.b32.xlu0 %v972_v29, %s3277_s27 }
 0x247   : > { %v944_v30 = vpop.permute.xlu1 %943 }
 0x248   : > { %v1077_v31 = vsub.f32 0.0, %v944_v30  ;;  %1118 = vrot.lane.b32.xlu1 %v944_v30, %s3280_s28  ;;  %v1149_v63 = vmul.f32 %v944_v30, %v3617_v45 }
 0x249   : > { %v1093_v43 = vpop.permute.xlu0 %1092 }
 0x24a   : > { %1094 = vrot.lane.b32.xlu0 %v1077_v31, %s3277_s27 }
 0x24b   : > { %v947_v32 = vpop.permute.xlu1 %946 }
 0x24c   : > { %v1078_v33 = vsub.f32 0.0, %v947_v32  ;;  %1120 = vrot.lane.b32.xlu1 %v947_v32, %s3280_s28  ;;  %v1150_v7 = vmul.f32 %v947_v32, %v3617_v45 }
 0x24e   : > { %1096 = vrot.lane.b32.xlu0 %v1078_v33, %s3277_s27 }
 0x24f   : > { %v3585_v34 = vpop.permute.xlu1 %949 }
 0x250   : > { %v1079_v35 = vsub.f32 0.0, %v3585_v34  ;;  %1122 = vrot.lane.b32.xlu1 %v3585_v34, %s3280_s28  ;;  %v1151_v17 = vmul.f32 %v3585_v34, %v3617_v45 }
 0x252   : > { %1098 = vrot.lane.b32.xlu0 %v1079_v35, %s3277_s27 }
 0x253   : > { %v3591_v36 = vpop.permute.xlu1 %924 }
 0x254   : > { %v973_v37 = vsub.f32 0.0, %v3591_v36  ;;  %1015 = vrot.lane.b32.xlu1 %v3591_v36, %s3280_s28  ;;  %v1046_v28 = vmul.f32 %v3591_v36, %v3617_v45 }
 0x256   : > { %991 = vrot.lane.b32.xlu0 %v973_v37, %s3277_s27 }
 0x257   : > { %v3597_v38 = vpop.permute.xlu1 %927 }
 0x258   : > { %v974_v39 = vsub.f32 0.0, %v3597_v38  ;;  %1017 = vrot.lane.b32.xlu1 %v3597_v38, %s3280_s28  ;;  %v1047_v36 = vmul.f32 %v3597_v38, %v3617_v45 }
 0x25a   : > { %993 = vrot.lane.b32.xlu0 %v974_v39, %s3277_s27 }
 0x25b   : > { %v876_v40 = vpop.permute.xlu1 %875 }
 0x25c   : > { %952 = vrot.lane.b32.xlu1 %v3559_v23, %s3281_s22  ;;  %2846 = vmatpush3.bf16.msra.mxu1 %v876_v40 }
 0x25d   : > { %2851 = vmatprep.subr.bf16.mxu1 %v3273_v6 }
 0x25e   : > { %955 = vrot.lane.b32.xlu0 %v3559_v23, %s3282_s0 }
 0x25f   : > { %v1012_v42 = vpop.permute.xlu1 %1011  ;;  %2848 = vmatmul.mubr.msk.bf16.vlgmr.msra.gmra.mrb[8].mxu1 %vm751_vm1, %v3541_v15 }
 0x260   : > { %2853 = vmatprep.mubr.msk.bf16.mxu1 %vm3274_vm2, %v3273_v6  ;;  %v1036_v50 = vsel %vm1035_vm3, %v988_v41, %v1012_v42 }
 0x261   : > { %v1052_v52 = vmul.f32 %v1036_v50, %v3624_v46  ;;  %v747_v50 = vld [vmem:[%s3481_s17] sm:$0xf]  ;;  %s3284_s17 = smov 100  }
 0x263   : > { %v1117_v44 = vpop.permute.xlu1 %1116  ;;  %v1060_v56 = vadd.f32 %v1052_v52, %v1044_v54 }
 0x264   : > { %v1140_v47 = vsel %vm1035_vm3, %v1093_v43, %v1117_v44 }
 0x265   : > { %v1156_v49 = vmul.f32 %v1140_v47, %v3624_v46  ;;  %v1068_v57 = vpack.c.bf16 %v1060_v56, %v1060_v56 }
 0x267   : > { %v1164_v51 = vadd.f32 %v1156_v49, %v1148_v48 }
 0x269   : > { %v1172_v53 = vpack.c.bf16 %v1164_v51, %v1164_v51  ;;  %v3682_v51 = vunpack.c.l.bf16 %v747_v50 }
 0x26b   : > { %v1185_v55 = vsel %vm1180_vm4, %v1172_v53, 0 }
 0x26c   : > { %2852 = vmatpush3.bf16.xpose.msra.mxu1 %v1185_v55 }
 0x26d   : > { %2863 = vmatprep.subr.bf16.mxu1 %v3273_v6 }
 0x273   : > { %2854 = vmatmul.mubr.msk.bf16.vlgmr.msra.gmra.mrb[12].mxu1 %vm1180_vm4, %v1068_v57 }
 0x274   : > { %2865 = vmatprep.mubr.msk.bf16.mxu1 %vm3274_vm2, %v3273_v6 }
 0x2b2   : > { %v1014_v58 = vpop.permute.xlu1 %1013 }
 0x2b4   : > { %v990_v59 = vpop.permute.xlu0 %989 }
 0x2b5   : > { %v1037_v2 = vsel %vm1035_vm3, %v990_v59, %v1014_v58 }
 0x2b6   : > { %v1053_v8 = vmul.f32 %v1037_v2, %v3624_v46 }
 0x2b8   : > { %v1061_v19 = vadd.f32 %v1053_v8, %v1045_v12 }
 0x2ba   : > { %v1119_v60 = vpop.permute.xlu1 %1118  ;;  %v1069_v29 = vpack.c.bf16 %v1061_v19, %v1061_v19 }
 0x2bc   : > { %v1095_v61 = vpop.permute.xlu0 %1094 }
 0x2bd   : > { %v1141_v62 = vsel %vm1035_vm3, %v1095_v61, %v1119_v60 }
 0x2be   : > { %v1157_v0 = vmul.f32 %v1141_v62, %v3624_v46  ;;  %v1121_v1 = vpop.permute.xlu1 %1120 }
 0x2c0   : > { %v1097_v3 = vpop.permute.xlu0 %1096  ;;  %v1165_v4 = vadd.f32 %v1157_v0, %v1149_v63 }
 0x2c1   : > { %v1142_v5 = vsel %vm1035_vm3, %v1097_v3, %v1121_v1 }
 0x2c2   : > { %v1158_v9 = vmul.f32 %v1142_v5, %v3624_v46  ;;  %v1123_v10 = vpop.permute.xlu1 %1122  ;;  %v1173_v11 = vpack.c.bf16 %v1165_v4, %v1165_v4 }
 0x2c4   : > { %v1166_v13 = vadd.f32 %v1158_v9, %v1150_v7  ;;  %v1099_v14 = vpop.permute.xlu0 %1098  ;;  %v1231_v15 = vsel %vm1180_vm4, %v1173_v11, 0 }
 0x2c5   : > { %v1143_v16 = vsel %vm1035_vm3, %v1099_v14, %v1123_v10  ;;  %2858 = vmatpush3.bf16.xpose.msra.mxu0 %v1231_v15 }
 0x2c6   : > { %v1174_v20 = vpack.c.bf16 %v1166_v13, %v1166_v13  ;;  %v1159_v21 = vmul.f32 %v1143_v16, %v3624_v46  ;;  %v1016_v22 = vpop.permute.xlu1 %1015  ;;  %2869 = vmatprep.subr.bf16.mxu0 %v3273_v6 }
 0x2c8   : > { %v1167_v24 = vadd.f32 %v1159_v21, %v1151_v17  ;;  %v992_v25 = vpop.permute.xlu0 %991  ;;  %v1277_v26 = vsel %vm1180_vm4, %v1174_v20, 0 }
 0x2c9   : > { %v1038_v27 = vsel %vm1035_vm3, %v992_v25, %v1016_v22  ;;  %2864 = vmatpush3.bf16.xpose.msra.mxu1 %v1277_v26 }
 0x2ca   : > { %v1175_v30 = vpack.c.bf16 %v1167_v24, %v1167_v24  ;;  %v1054_v31 = vmul.f32 %v1038_v27, %v3624_v46  ;;  %2875 = vmatprep.subr.bf16.mxu1 %v3273_v6  ;;  %v1018_v33 = vpop.permute.xlu1 %1017 }
 0x2cc   : > { %v1062_v32 = vadd.f32 %v1054_v31, %v1046_v28  ;;  %2860 = vmatmul.mubr.msk.bf16.vlgmr.msra.gmra.mrb[0].mxu0 %vm1180_vm4, %v1069_v29  ;;  %v994_v34 = vpop.permute.xlu0 %993  ;;  %v1323_v35 = vsel %vm1180_vm4, %v1175_v30, 0 }
 0x2cd   : > { %v1039_v37 = vsel %vm1035_vm3, %v994_v34, %v1018_v33  ;;  %2870 = vmatpush3.bf16.xpose.msra.mxu0 %v1323_v35  ;;  %2871 = vmatprep.mubr.msk.bf16.mxu0 %vm3274_vm2, %v3273_v6 }
 0x2ce   : > { %v1070_v39 = vpack.c.bf16 %v1062_v32, %v1062_v32  ;;  %v1055_v40 = vmul.f32 %v1039_v37, %v3624_v46  ;;  %2881 = vmatprep.subr.bf16.mxu0 %v3273_v6  ;;  %v3693_v59 = vpop.permute.xlu1 %952 }
 0x2cf   : > { %v1080_v13 = vsub.f32 0.0, %v3693_v59 }
 0x2d0   : > { %v1063_v41 = vadd.f32 %v1055_v40, %v1047_v36  ;;  %2866 = vmatmul.mubr.msk.bf16.vlgmr.msra.gmra.mrb[16].mxu1 %vm1180_vm4, %v1070_v39  ;;  %v3697_v60 = vpop.permute.xlu0 %955 }
 0x2d1   : > { %2877 = vmatprep.mubr.msk.bf16.mxu1 %vm3274_vm2, %v3273_v6  ;;  %v1081_v14 = vsub.f32 0.0, %v3697_v60 }
 0x2d2   : > { %v1071_v42 = vpack.c.bf16 %v1063_v41, %v1063_v41 }
 0x2d4   : > { %2872 = vmatmul.mubr.msk.bf16.vlgmr.msra.gmra.mrb[4].mxu0 %vm1180_vm4, %v1071_v42 }
 0x2d5   : > { %2883 = vmatprep.mubr.msk.bf16.mxu0 %vm3274_vm2, %v3273_v6 }
 0x332   : > { %v913_v43 = vpop.f32.mrb[8].mxu1 }
 0x333   : > { %v919_v38 = vpack.c.bf16 %v913_v43, %v913_v43  ;;  %v2849_v44 = vpop.f32.mrb[9].mxu1 }
 0x334   : > { %v916_v47 = vpop.f32.mrb[10].mxu1 }
 0x335   : > { %v2850_v48 = vpop.f32.mrb[11].mxu1  ;;  %v3677_v49 = vsel %vm1425_vm5, %v919_v38, 0 }
 0x336   : > { %2876 = vmatpush3.bf16.msra.mxu1 %v3677_v49 }
 0x337   : > { %2887 = vmatprep.subr.bf16.mxu1 %v3273_v6 }
 0x346   : > { %v1221_v52 = vpop.f32.mrb[12].mxu1 }
 0x347   : > { %v1365_v53 = vmul.f32 0.5, %v1221_v52  ;;  %v2855_v54 = vpop.f32.mrb[13].mxu1 }
 0x348   : > { %v1224_v55 = vpop.f32.mrb[14].mxu1 }
 0x349   : > { %v2856_v56 = vpop.f32.mrb[15].mxu1  ;;  %v3685_v57 = vadd.f32 %v1365_v53, %v3682_v51 }
 0x34b   : > { %v1374_v58 = vsel %vm1373_vm6, %v3685_v57, -inf }
 0x34c   : > { %1375 = vmax.xlane.f32.xlu0 %v1374_v58 }
 0x362   : > { %933 = vrot.lane.b32.xlu0 %v3554_v18, %s3282_s0 }
 0x366   : > { %936 = vrot.lane.b32.xlu0 %v3554_v18, %s3283_s25 }
 0x36a   : > { %967 = vrot.lane.b32.xlu0 %v919_v38, %s3281_s22 }
 0x36e   : > { %1124 = vrot.lane.b32.xlu0 %v3693_v59, %s3280_s28 }
 0x372   : > { %1126 = vrot.lane.b32.xlu0 %v3697_v60, %s3280_s28 }
 0x39f   : > { %v1267_v61 = vpop.f32.mrb[0].mxu0 }
 0x3a0   : > { %v1366_v62 = vmul.f32 0.5, %v1267_v61  ;;  %v2861_v63 = vpop.f32.mrb[1].mxu0 }
 0x3a1   : > { %v1270_v0 = vpop.f32.mrb[2].mxu0 }
 0x3a2   : > { %v2862_v1 = vpop.f32.mrb[3].mxu0  ;;  %v1370_v2 = vadd.f32 %v1366_v62, %v3682_v51 }
 0x3a3   : > { %v1313_v3 = vpop.f32.mrb[16].mxu1 }
 0x3a4   : > { %v2867_v4 = vpop.f32.mrb[17].mxu1  ;;  %v1377_v5 = vsel %vm1373_vm6, %v1370_v2, -inf  ;;  %v1367_v25 = vmul.f32 0.5, %v1313_v3 }
 0x3a5   : > { %1378 = vmax.xlane.f32.xlu1 %v1377_v5  ;;  %v1316_v7 = vpop.f32.mrb[18].mxu1 }
 0x3a6   : > { %v2868_v8 = vpop.f32.mrb[19].mxu1  ;;  %v1371_v28 = vadd.f32 %v1367_v25, %v3682_v51 }
 0x3a7   : > { %v1359_v9 = vpop.f32.mrb[4].mxu0 }
 0x3a8   : > { %v2873_v10 = vpop.f32.mrb[5].mxu0  ;;  %v1368_v27 = vmul.f32 0.5, %v1359_v9  ;;  %v1380_v29 = vsel %vm1373_vm6, %v1371_v28, -inf }
 0x3a9   : > { %v1362_v11 = vpop.f32.mrb[6].mxu0 }
 0x3aa   : > { %v2874_v12 = vpop.f32.mrb[7].mxu0  ;;  %v1372_v30 = vadd.f32 %v1368_v27, %v3682_v51 }
 0x3ac   : > { %v1383_v31 = vsel %vm1373_vm6, %v1372_v30, -inf }
 0x3b6   : > { %930 = vrot.lane.b32.xlu1 %v3554_v18, %s3281_s22  ;;  %s739_s22 = sadd.s32 1, %s2706_s21 }
 0x3b7   : > { %s740_s0 = sld [smem:[#allocation4 + %s739_s22]] }
 0x3ba   : > { %958 = vrot.lane.b32.xlu1 %v3559_v23, %s3283_s25 }
 0x3bd   : > { %s2162_s29 = ssub.f32 1.0, %s740_s0 }
 0x3be   : > { %961 = vrot.lane.b32.xlu1 %v3559_v23, %s3284_s17 }
 0x3c2   : > { %939 = vrot.lane.b32.xlu1 %v3554_v18, %s3284_s17 }
 0x3c6   : > { %965 = vrot.lane.b32.xlu1 %v919_v38, %s3278_s13 }
 0x3ca   : > { %969 = vrot.lane.b32.xlu1 %v919_v38, %s3283_s25 }
 0x3ce   : > { %1100 = vrot.lane.b32.xlu1 %v1080_v13, %s3277_s27 }
 0x3d2   : > { %1102 = vrot.lane.b32.xlu1 %v1081_v14, %s3277_s27 }
 0x3d9   : > { %v1376_v34 = vpop.xlane.xlu0 %1375 }
 0x3da   : > { %v1386_v41 = vsub.f32 %v3685_v57, %v1376_v34 }
 0x3dc   : > { %v1390_v43 = vmul.f32 1.442695, %v1386_v41 }
 0x3dd   : > { %v3733_v35 = vpop.permute.xlu0 %933 }
 0x3de   : > { %v976_v37 = vsub.f32 0.0, %v3733_v35 }
 0x3e1   : > { %v3740_v39 = vpop.permute.xlu0 %936 }
 0x3e2   : > { %v977_v40 = vsub.f32 0.0, %v3740_v39 }
 0x3e5   : > { %v968_v47 = vpop.permute.xlu0 %967 }
 0x3e9   : > { %v1125_v50 = vpop.permute.xlu0 %1124 }
 0x3ed   : > { %v1127_v53 = vpop.permute.xlu0 %1126 }
 0x432   : > { %v1379_v15 = vpop.xlane.xlu1 %1378 }
 0x433   : > { %v1387_v24 = vsub.f32 %v1370_v2, %v1379_v15 }
 0x435   : > { %v1392_v26 = vmul.f32 1.442695, %v1387_v24 }
 0x436   : > { %v931_v16 = vpop.permute.xlu1 %930 }
 0x437   : > { %v975_v17 = vsub.f32 0.0, %v931_v16  ;;  %1019 = vrot.lane.b32.xlu0 %v931_v16, %s3280_s28  ;;  %3107 = vpow2.f32 %v1392_v26  ;;  %v1048_v58 = vmul.f32 %v931_v16, %v3617_v45 }
 0x438   : > { %3109 = vpow2.f32 %v1390_v43  ;;  %v1153_v43 = vmul.f32 %v3697_v60, %v3617_v45 }
 0x439   : > { %995 = vrot.lane.b32.xlu1 %v975_v17, %s3277_s27 }
 0x43a   : > { %v3715_v23 = vpop.permute.xlu1 %958 }
 0x43b   : > { %v1082_v18 = vsub.f32 0.0, %v3715_v23  ;;  %v1154_v9 = vmul.f32 %v3715_v23, %v3617_v45 }
 0x43d   : > { %1104 = vrot.lane.b32.xlu1 %v1082_v18, %s3277_s27 }
 0x43e   : > { %v3719_v19 = vpop.permute.xlu1 %961 }
 0x43f   : > { %v1083_v36 = vsub.f32 0.0, %v3719_v19 }
 0x441   : > { %v3108_v32 = vpop.eup %3107 }
 0x442   : > { %v3721_v20 = vpop.permute.xlu1 %939  ;;  %v1401_v33 = vsel %vm1373_vm6, %v3108_v32, 0.0  ;;  %v3110_v38 = vpop.eup %3109 }
 0x443   : > { %v978_v42 = vsub.f32 0.0, %v3721_v20  ;;  %v1398_v44 = vsel %vm1373_vm6, %v3110_v38, 0.0 }
 0x446   : > { %v966_v21 = vpop.permute.xlu1 %965 }
 0x447   : > { %v3724_v22 = vsel %vm1425_vm5, %v966_v21, 0 }
 0x448   : > { %2882 = vmatpush3.bf16.msra.mxu0 %v3724_v22 }
 0x449   : > { %2893 = vmatprep.subr.bf16.mxu0 %v3273_v6 }
 0x44a   : > { %v970_v48 = vpop.permute.xlu1 %969 }
 0x44b   : > { %v3765_v24 = vsel %vm1425_vm5, %v970_v48, 0 }
 0x44e   : > { %v1101_v52 = vpop.permute.xlu1 %1100 }
 0x452   : > { %v1103_v54 = vpop.permute.xlu1 %1102 }
 0x456   : > { %1381 = vmax.xlane.f32.xlu0 %v1380_v29 }
 0x45a   : > { %1384 = vmax.xlane.f32.xlu0 %v1383_v31  ;;  %v1144_v31 = vsel %vm1035_vm3, %v1101_v52, %v1125_v50 }
 0x461   : > { %1402 = vadd.xlane.f32.xlu1 %v1401_v33 }
 0x470   : > { %1128 = vrot.lane.b32.xlu0 %v3715_v23, %s3280_s28 }
 0x472   : > { %997 = vrot.lane.b32.xlu1 %v976_v37, %s3277_s27  ;;  %v1145_v37 = vsel %vm1035_vm3, %v1103_v54, %v1127_v53 }
 0x473   : > { %v1161_v41 = vmul.f32 %v1145_v37, %v3624_v46 }
 0x475   : > { %v1169_v48 = vadd.f32 %v1161_v41, %v1153_v43 }
 0x476   : > { %1106 = vrot.lane.b32.xlu1 %v1083_v36, %s3277_s27  ;;  %v1152_v36 = vmul.f32 %v3693_v59, %v3617_v45 }
 0x477   : > { %v1177_v59 = vpack.c.bf16 %v1169_v48, %v1169_v48 }
 0x47a   : > { %999 = vrot.lane.b32.xlu1 %v977_v40, %s3277_s27 }
 0x47e   : > { %1001 = vrot.lane.b32.xlu1 %v978_v42, %s3277_s27  ;;  %s738_s27 = sld [smem:[#allocation4 + %s2706_s21]] }
 0x48f   : > { %1399 = vadd.xlane.f32.xlu0 %v1398_v44 }
 0x4a5   : > { %1021 = vrot.lane.b32.xlu0 %v3733_v35, %s3280_s28 }
 0x4a9   : > { %v1020_v55 = vpop.permute.xlu0 %1019 }
 0x4ab   : > { %v996_v56 = vpop.permute.xlu1 %995 }
 0x4ac   : > { %v1040_v57 = vsel %vm1035_vm3, %v996_v56, %v1020_v55 }
 0x4ad   : > { %v1056_v61 = vmul.f32 %v1040_v57, %v3624_v46 }
 0x4af   : > { %v3754_v62 = vadd.f32 %v1056_v61, %v1048_v58  ;;  %v1105_v4 = vpop.permute.xlu1 %1104 }
 0x4e3   : > { %v1382_v63 = vpop.xlane.xlu0 %1381 }
 0x4e4   : > { %v1388_v0 = vsub.f32 %v1371_v28, %v1382_v63  ;;  %v3779_v28 = vsel %vm1425_vm5, %v968_v47, 0  ;;  %v1155_v63 = vmul.f32 %v3719_v19, %v3617_v45 }
 0x4e6   : > { %v1394_v1 = vmul.f32 1.442695, %v1388_v0 }
 0x4e7   : > { %v1385_v2 = vpop.xlane.xlu0 %1384 }
 0x4e8   : > { %3111 = vpow2.f32 %v1394_v1  ;;  %v1389_v3 = vsub.f32 %v1372_v30, %v1385_v2 }
 0x4ea   : > { %v1396_v5 = vmul.f32 1.442695, %v1389_v3  ;;  %v1049_v3 = vmul.f32 %v3733_v35, %v3617_v45 }
 0x4eb   : > { %v1129_v7 = vpop.permute.xlu0 %1128 }
 0x4ec   : > { %3113 = vpow2.f32 %v1396_v5  ;;  %v1146_v8 = vsel %vm1035_vm3, %v1105_v4, %v1129_v7 }
 0x4ed   : > { %v1162_v10 = vmul.f32 %v1146_v8, %v3624_v46  ;;  %v1657_v8 = vsel %vm1180_vm4, %v1177_v59, 0 }
 0x4ee   : > { %v1403_v11 = vpop.xlane.xlu1 %1402 }
 0x4ef   : > { %v3760_v12 = vadd.f32 %v1162_v10, %v1154_v9  ;;  %3115 = vrcp.f32 %v1403_v11 }
 0x4f1   : > { %v1178_v4 = vpack.c.bf16 %v3760_v12, %v3760_v12  ;;  %v1050_v12 = vmul.f32 %v3740_v39, %v3617_v45 }
 0x4f2   : > { %v3112_v13 = vpop.eup %3111  ;;  %v998_v33 = vpop.permute.xlu1 %997 }
 0x4f3   : > { %v1404_v14 = vsel %vm1373_vm6, %v3112_v13, 0.0 }
 0x4f4   : > { %1405 = vadd.xlane.f32.xlu0 %v1404_v14  ;;  %v1703_v14 = vsel %vm1180_vm4, %v1178_v4, 0 }
 0x4f6   : > { %v3114_v15 = vpop.eup %3113 }
 0x4f7   : > { %v1407_v16 = vsel %vm1373_vm6, %v3114_v15, 0.0 }
 0x4f8   : > { %1408 = vadd.xlane.f32.xlu0 %v1407_v16 }
 0x4f9   : > { %v3116_v17 = vpop.eup %3115 }
 0x4fa   : > { %v1413_v18 = vmul.f32 %v3116_v17, %v3108_v32  ;;  %v1160_v32 = vmul.f32 %v1144_v31, %v3624_v46  ;;  %v1051_v17 = vmul.f32 %v3721_v20, %v3617_v45 }
 0x4fc   : > { %v1419_v21 = vpack.c.bf16 %v1413_v18, %v1413_v18  ;;  %v1168_v40 = vadd.f32 %v1160_v32, %v1152_v36 }
 0x4fe   : > { %2884 = vmatmul.mubr.msk.bf16.vlgmr.msra.gmra.mrb[8].mxu0 %vm1373_vm6, %v1419_v21  ;;  %v1176_v47 = vpack.c.bf16 %v1168_v40, %v1168_v40 }
 0x4ff   : > { %2894 = vmatpush3.bf16.msra.mxu0 %v3765_v24  ;;  %2895 = vmatprep.mubr.msk.bf16.mxu0 %vm3274_vm2, %v3273_v6 }
 0x500   : > { %2905 = vmatprep.subr.bf16.mxu0 %v3273_v6  ;;  %v1611_v60 = vsel %vm1180_vm4, %v1176_v47, 0 }
 0x50e   : > { %1130 = vrot.lane.b32.xlu0 %v3719_v19, %s3280_s28  ;;  %v1072_v19 = vpack.c.bf16 %v3754_v62, %v3754_v62 }
 0x512   : > { %1023 = vrot.lane.b32.xlu0 %v3740_v39, %s3280_s28 }
 0x516   : > { %1025 = vrot.lane.b32.xlu0 %v3721_v20, %s3280_s28  ;;  %s3285_s28 = smov 8  }
 0x51c   : > { %v1400_v23 = vpop.xlane.xlu0 %1399 }
 0x51d   : > { %3117 = vrcp.f32 %v1400_v23 }
 0x520   : > { %v1022_v29 = vpop.permute.xlu0 %1021 }
 0x521   : > { %v1041_v56 = vsel %vm1035_vm3, %v998_v33, %v1022_v29 }
 0x522   : > { %v1057_v0 = vmul.f32 %v1041_v56, %v3624_v46 }
 0x524   : > { %v1065_v10 = vadd.f32 %v1057_v0, %v1049_v3 }
 0x526   : > { %v1073_v62 = vpack.c.bf16 %v1065_v10, %v1065_v10 }
 0x527   : > { %v3118_v25 = vpop.eup %3117 }
 0x528   : > { %v1411_v26 = vmul.f32 %v3118_v25, %v3110_v38  ;;  %v1107_v38 = vpop.permute.xlu1 %1106 }
 0x52a   : > { %v1418_v27 = vpack.c.bf16 %v1411_v26, %v1411_v26 }
 0x52c   : > { %2878 = vmatmul.mubr.msk.bf16.vlgmr.msra.gmra.mrb[20].mxu1 %vm1373_vm6, %v1418_v27  ;;  %v1000_v57 = vpop.permute.xlu1 %999 }
 0x52d   : > { %2888 = vmatpush3.bf16.msra.mxu1 %v3779_v28  ;;  %2889 = vmatprep.mubr.msk.bf16.mxu1 %vm3274_vm2, %v3273_v6 }
 0x52e   : > { %2899 = vmatprep.subr.bf16.mxu1 %v3273_v6 }
 0x530   : > { %v1002_v9 = vpop.permute.xlu1 %1001 }
 0x581   : > { %v1406_v30 = vpop.xlane.xlu0 %1405 }
 0x582   : > { %3119 = vrcp.f32 %v1406_v30 }
 0x585   : > { %v1409_v34 = vpop.xlane.xlu0 %1408 }
 0x586   : > { %3121 = vrcp.f32 %v1409_v34 }
 0x589   : > { %v1131_v42 = vpop.permute.xlu0 %1130 }
 0x58a   : > { %v1147_v52 = vsel %vm1035_vm3, %v1107_v38, %v1131_v42 }
 0x58b   : > { %v1163_v61 = vmul.f32 %v1147_v52, %v3624_v46 }
 0x58c   : > { %v3120_v44 = vpop.eup %3119 }
 0x58d   : > { %v1415_v50 = vmul.f32 %v3120_v44, %v3112_v13  ;;  %v1024_v55 = vpop.permute.xlu0 %1023  ;;  %v1171_v5 = vadd.f32 %v1163_v61, %v1155_v63 }
 0x58e   : > { %v1042_v2 = vsel %vm1035_vm3, %v1000_v57, %v1024_v55 }
 0x58f   : > { %v1420_v53 = vpack.c.bf16 %v1415_v50, %v1415_v50  ;;  %v1058_v35 = vmul.f32 %v1042_v2, %v3624_v46  ;;  %v1179_v13 = vpack.c.bf16 %v1171_v5, %v1171_v5 }
 0x590   : > { %v3122_v54 = vpop.eup %3121 }
 0x591   : > { %v1417_v58 = vmul.f32 %v3122_v54, %v3114_v15  ;;  %2890 = vmatmul.mubr.msk.bf16.vlgmr.msra.gmra.mrb[24].mxu1 %vm1373_vm6, %v1420_v53  ;;  %v1026_v7 = vpop.permute.xlu0 %1025  ;;  %v1066_v15 = vadd.f32 %v1058_v35, %v1050_v12  ;;  %v1749_v39 = vsel %vm1180_vm4, %v1179_v13, 0 }
 0x592   : > { %2900 = vmatpush3.bf16.xpose.msra.mxu1 %v1611_v60  ;;  %2901 = vmatprep.mubr.msk.bf16.mxu1 %vm3274_vm2, %v3273_v6  ;;  %v1043_v11 = vsel %vm1035_vm3, %v1002_v9, %v1026_v7 }
 0x593   : > { %v1421_v1 = vpack.c.bf16 %v1417_v58, %v1417_v58  ;;  %2911 = vmatprep.subr.bf16.mxu1 %v3273_v6  ;;  %v1059_v16 = vmul.f32 %v1043_v11, %v3624_v46  ;;  %v1074_v18 = vpack.c.bf16 %v1066_v15, %v1066_v15 }
 0x595   : > { %2896 = vmatmul.mubr.msk.bf16.vlgmr.msra.gmra.mrb[12].mxu0 %vm1373_vm6, %v1421_v1  ;;  %v1067_v21 = vadd.f32 %v1059_v16, %v1051_v17 }
 0x596   : > { %2906 = vmatpush3.bf16.xpose.msra.mxu0 %v1657_v8  ;;  %2907 = vmatprep.mubr.msk.bf16.mxu0 %vm3274_vm2, %v3273_v6 }
 0x597   : > { %2917 = vmatprep.subr.bf16.mxu0 %v3273_v6  ;;  %v1075_v45 = vpack.c.bf16 %v1067_v21, %v1067_v21 }
 0x599   : > { %2902 = vmatmul.mubr.msk.bf16.vlgmr.msra.gmra.mrb[28].mxu1 %vm1180_vm4, %v1072_v19 }
 0x59a   : > { %2912 = vmatpush3.bf16.xpose.msra.mxu1 %v1703_v14  ;;  %2913 = vmatprep.mubr.msk.bf16.mxu1 %vm3274_vm2, %v3273_v6 }
 0x59b   : > { %2923 = vmatprep.subr.bf16.mxu1 %v3273_v6 }
 0x59d   : > { %2908 = vmatmul.mubr.msk.bf16.vlgmr.msra.gmra.mrb[16].mxu0 %vm1180_vm4, %v1073_v62 }
 0x59e   : > { %2918 = vmatpush3.bf16.xpose.msra.mxu0 %v1749_v39  ;;  %2919 = vmatprep.mubr.msk.bf16.mxu0 %vm3274_vm2, %v3273_v6 }
 0x59f   : > { %2929 = vmatprep.subr.bf16.mxu0 %v3273_v6 }
 0x5a1   : > { %2914 = vmatmul.mubr.msk.bf16.vlgmr.msra.gmra.mrb[32].mxu1 %vm1180_vm4, %v1074_v18 }
 0x5a2   : > { %2924 = vmatpush3.bf16.msra.mxu1 %v3677_v49  ;;  %2925 = vmatprep.mubr.msk.bf16.mxu1 %vm3274_vm2, %v3273_v6 }
 0x5a3   : > { %2935 = vmatprep.subr.bf16.mxu1 %v3273_v6 }
 0x5a5   : > { %2920 = vmatmul.mubr.msk.bf16.vlgmr.msra.gmra.mrb[20].mxu0 %vm1180_vm4, %v1075_v45 }
 0x5a6   : > { %2930 = vmatpush3.bf16.msra.mxu0 %v3724_v22  ;;  %2931 = vmatprep.mubr.msk.bf16.mxu0 %vm3274_vm2, %v3273_v6 }
 0x5a7   : > { %2941 = vmatprep.subr.bf16.mxu0 %v3273_v6 }
 0x5d1   : > { %v3844_v46 = vpop.f32.mrb[8].mxu0 }
 0x5d2   : > { %v2885_v20 = vpop.f32.mrb[9].mxu0 }
 0x5d3   : > { %v1512_v23 = vpop.f32.mrb[10].mxu0 }
 0x5d4   : > { %v2886_v49 = vpop.f32.mrb[11].mxu0 }
 0x5ff   : > { %v3846_v25 = vpop.f32.mrb[20].mxu1 }
 0x600   : > { %v2879_v26 = vpop.f32.mrb[21].mxu1 }
 0x601   : > { %v1466_v27 = vpop.f32.mrb[22].mxu1 }
 0x602   : > { %v2880_v29 = vpop.f32.mrb[23].mxu1 }
 0x664   : > { %v3848_v30 = vpop.f32.mrb[24].mxu1 }
 0x665   : > { %v2891_v31 = vpop.f32.mrb[25].mxu1 }
 0x666   : > { %v1558_v32 = vpop.f32.mrb[26].mxu1 }
 0x667   : > { %v2892_v22 = vpop.f32.mrb[27].mxu1 }
 0x668   : > { %v3850_v33 = vpop.f32.mrb[12].mxu0 }
 0x669   : > { %v2897_v34 = vpop.f32.mrb[13].mxu0 }
 0x66a   : > { %v1604_v37 = vpop.f32.mrb[14].mxu0 }
 0x66b   : > { %v2898_v36 = vpop.f32.mrb[15].mxu0 }
 0x66c   : > { %v1647_v40 = vpop.f32.mrb[28].mxu1 }
 0x66d   : > { %v1791_v41 = vmul.f32 0.5, %v1647_v40  ;;  %v2903_v42 = vpop.f32.mrb[29].mxu1 }
 0x66e   : > { %v1650_v43 = vpop.f32.mrb[30].mxu1 }
 0x66f   : > { %v2904_v38 = vpop.f32.mrb[31].mxu1  ;;  %v1795_v44 = vadd.f32 %v1791_v41, %v3682_v51 }
 0x670   : > { %v1693_v47 = vpop.f32.mrb[16].mxu0 }
 0x671   : > { %v1792_v48 = vmul.f32 0.5, %v1693_v47  ;;  %v2909_v50 = vpop.f32.mrb[17].mxu0  ;;  %v1799_v52 = vsel %vm1373_vm6, %v1795_v44, -inf }
 0x672   : > { %1800 = vmax.xlane.f32.xlu1 %v1799_v52  ;;  %v1696_v55 = vpop.f32.mrb[18].mxu0 }
 0x673   : > { %v2910_v53 = vpop.f32.mrb[19].mxu0  ;;  %v1796_v54 = vadd.f32 %v1792_v48, %v3682_v51 }
 0x674   : > { %v1739_v56 = vpop.f32.mrb[32].mxu1 }
 0x675   : > { %v1793_v59 = vmul.f32 0.5, %v1739_v56  ;;  %v2915_v57 = vpop.f32.mrb[33].mxu1  ;;  %v1802_v58 = vsel %vm1373_vm6, %v1796_v54, -inf }
 0x676   : > { %1803 = vmax.xlane.f32.xlu0 %v1802_v58  ;;  %v1742_v61 = vpop.f32.mrb[34].mxu1 }
 0x677   : > { %v2916_v60 = vpop.f32.mrb[35].mxu1  ;;  %v1797_v63 = vadd.f32 %v1793_v59, %v3682_v51 }
 0x678   : > { %v1785_v0 = vpop.f32.mrb[20].mxu0 }
 0x679   : > { %v1794_v1 = vmul.f32 0.5, %v1785_v0  ;;  %v2921_v2 = vpop.f32.mrb[21].mxu0  ;;  %v1805_v3 = vsel %vm1373_vm6, %v1797_v63, -inf }
 0x67a   : > { %1806 = vmax.xlane.f32.xlu0 %v1805_v3  ;;  %v1788_v4 = vpop.f32.mrb[22].mxu0 }
 0x67b   : > { %v2922_v5 = vpop.f32.mrb[23].mxu0  ;;  %v1798_v7 = vadd.f32 %v1794_v1, %v3682_v51 }
 0x67d   : > { %v1808_v8 = vsel %vm1373_vm6, %v1798_v7, -inf }
 0x67e   : > { %1809 = vmax.xlane.f32.xlu1 %v1808_v8 }
 0x6ff   : > { %v1801_v19 = vpop.xlane.xlu1 %1800 }
 0x700   : > { %v1811_v9 = vsub.f32 %v1795_v44, %v1801_v19 }
 0x702   : > { %v1815_v10 = vmul.f32 1.442695, %v1811_v9 }
 0x703   : > { %v1804_v35 = vpop.xlane.xlu0 %1803 }
 0x704   : > { %3123 = vpow2.f32 %v1815_v10  ;;  %v1812_v11 = vsub.f32 %v1796_v54, %v1804_v35 }
 0x706   : > { %v1817_v12 = vmul.f32 1.442695, %v1812_v11 }
 0x707   : > { %v1807_v13 = vpop.xlane.xlu0 %1806 }
 0x708   : > { %3125 = vpow2.f32 %v1817_v12  ;;  %v1813_v14 = vsub.f32 %v1797_v63, %v1807_v13 }
 0x70a   : > { %v1819_v62 = vmul.f32 1.442695, %v1813_v14 }
 0x70b   : > { %v1810_v15 = vpop.xlane.xlu1 %1809 }
 0x70c   : > { %3127 = vpow2.f32 %v1819_v62  ;;  %v1814_v16 = vsub.f32 %v1798_v7, %v1810_v15 }
 0x70e   : > { %v3124_v17 = vpop.eup %3123  ;;  %v1821_v39 = vmul.f32 1.442695, %v1814_v16 }
 0x70f   : > { %v1823_v51 = vsel %vm1373_vm6, %v3124_v17, 0.0 }
 0x710   : > { %3129 = vpow2.f32 %v1821_v39  ;;  %1824 = vadd.xlane.f32.xlu0 %v1823_v51 }
 0x712   : > { %v3126_v18 = vpop.eup %3125 }
 0x713   : > { %v1826_v21 = vsel %vm1373_vm6, %v3126_v18, 0.0 }
 0x714   : > { %1827 = vadd.xlane.f32.xlu1 %v1826_v21 }
 0x716   : > { %v3128_v45 = vpop.eup %3127 }
 0x717   : > { %v1829_v20 = vsel %vm1373_vm6, %v3128_v45, 0.0 }
 0x718   : > { %1830 = vadd.xlane.f32.xlu0 %v1829_v20 }
 0x71a   : > { %v3130_v23 = vpop.eup %3129 }
 0x71b   : > { %v1832_v49 = vsel %vm1373_vm6, %v3130_v23, 0.0 }
 0x71c   : > { %1833 = vadd.xlane.f32.xlu1 %v1832_v49  ;;  %v2729_v49 = vld [vmem:[%s697_s30] ss:$0 sm:$0xff]  ;;  %s3286_s30 = smov 16  }
 0x79d   : > { %v1825_v26 = vpop.xlane.xlu0 %1824 }
 0x79e   : > { %3131 = vrcp.f32 %v1825_v26 }
 0x7a1   : > { %v1828_v27 = vpop.xlane.xlu1 %1827 }
 0x7a2   : > { %3133 = vrcp.f32 %v1828_v27  ;;  %v3091_v27 = vld [vmem:[%s3494_s24] sm:$0xff]  }
 0x7a5   : > { %v1831_v29 = vpop.xlane.xlu0 %1830 }
 0x7a6   : > { %3135 = vrcp.f32 %v1831_v29 }
 0x7a8   : > { %v3132_v31 = vpop.eup %3131 }
 0x7a9   : > { %v1836_v32 = vmul.f32 %v3132_v31, %v3124_v17  ;;  %v1834_v22 = vpop.xlane.xlu1 %1833 }
 0x7aa   : > { %3137 = vrcp.f32 %v1834_v22 }
 0x7ab   : > { %v1843_v34 = vpack.c.bf16 %v1836_v32, %v1836_v32  ;;  %v3092_v32 = vld [vmem:[%s3494_s24 + $0x8] sm:$0xff]   ;;  %s3287_s24 = smov 24  }
 0x7ac   : > { %v3134_v37 = vpop.eup %3133 }
 0x7ad   : > { %v1838_v36 = vmul.f32 %v3134_v37, %v3126_v18  ;;  %2926 = vmatmul.mubr.msk.bf16.vlgmr.msra.gmra.mrb[36].mxu1 %vm1373_vm6, %v1843_v34 }
 0x7ae   : > { %2936 = vmatpush3.bf16.msra.mxu1 %v3779_v28  ;;  %2937 = vmatprep.mubr.msk.bf16.mxu1 %vm3274_vm2, %v3273_v6 }
 0x7af   : > { %v1844_v40 = vpack.c.bf16 %v1838_v36, %v1838_v36  ;;  %2947 = vmatprep.subr.bf16.mxu1 %v3273_v6 }
 0x7b0   : > { %v3136_v41 = vpop.eup %3135 }
 0x7b1   : > { %v1840_v42 = vmul.f32 %v3136_v41, %v3128_v45  ;;  %2932 = vmatmul.mubr.msk.bf16.vlgmr.msra.gmra.mrb[24].mxu0 %vm1373_vm6, %v1844_v40 }
 0x7b2   : > { %2942 = vmatpush3.bf16.msra.mxu0 %v3765_v24  ;;  %2943 = vmatprep.mubr.msk.bf16.mxu0 %vm3274_vm2, %v3273_v6  ;;  %v2019_v24 = vstv %s738_s27 }
 0x7b3   : > { %v1845_v43 = vpack.c.bf16 %v1840_v42, %v1840_v42  ;;  %2955 = vmatprep.subr.bf16.mxu0 %v3273_v6 }
 0x7b4   : > { %v3138_v28 = vpop.eup %3137 }
 0x7b5   : > { %v1842_v38 = vmul.f32 %v3138_v28, %v3130_v23  ;;  %2938 = vmatmul.mubr.msk.bf16.vlgmr.msra.gmra.mrb[40].mxu1 %vm1373_vm6, %v1845_v43 }
 0x7b6   : > { %2951 = vmatprep.mubr.msk.bf16.mxu1 %vm3274_vm2, %v3273_v6  ;;  %2948 = vmatpush3.bf16.msra.mxu1 %v3091_v27 }
 0x7b7   : > { %v1846_v44 = vpack.c.bf16 %v1842_v38, %v1842_v38  ;;  %2949 = vmatprep.subr.bf16.mxu1 %v3273_v6 }
 0x7b9   : > { %2944 = vmatmul.mubr.msk.bf16.vlgmr.msra.gmra.mrb[28].mxu0 %vm1373_vm6, %v1846_v44 }
 0x7ba   : > { %2959 = vmatprep.mubr.msk.bf16.mxu0 %vm3274_vm2, %v3273_v6  ;;  %2950 = vmatpush3.bf16.msra.mxu1 %v3092_v32 }
 0x7bb   : > { %2963 = vmatprep.subr.bf16.mxu1 %v3273_v6 }
 0x880   : > { %v1884_v47 = vpop.f32.mrb[36].mxu1 }
 0x881   : > { %v2020_v48 = vmul.f32 %v2019_v24, %v1884_v47  ;;  %v2927_v50 = vpop.f32.mrb[37].mxu1 }
 0x882   : > { %v1887_v52 = vpop.f32.mrb[38].mxu1 }
 0x883   : > { %v3884_v55 = vsub.f32 %v3846_v25, %v2020_v48  ;;  %v2928_v53 = vpop.f32.mrb[39].mxu1 }
 0x884   : > { %v1927_v54 = vpop.f32.mrb[24].mxu0 }
 0x885   : > { %v2021_v56 = vmul.f32 %v2019_v24, %v1927_v54  ;;  %v2933_v59 = vpop.f32.mrb[25].mxu0  ;;  %v2029_v11 = vmul.f32 %v3884_v55, %v3884_v55 }
 0x886   : > { %v1930_v57 = vpop.f32.mrb[26].mxu0 }
 0x887   : > { %v2025_v58 = vsub.f32 %v3844_v46, %v2021_v56  ;;  %v2934_v61 = vpop.f32.mrb[27].mxu0  ;;  %v2033_v13 = vsel %vm1373_vm6, %v2029_v11, 0.0  ;;  %v3153_v57 = vld [vmem:[%s3520_s19] sm:$0xff] }
 0x888   : > { %v1970_v60 = vpop.f32.mrb[40].mxu1  ;;  %v3098_v11 = vld [vmem:[%s3518_s14 + $0x8] sm:$0xff]  }
 0x889   : > { %v2022_v63 = vmul.f32 %v2019_v24, %v1970_v60  ;;  %v2939_v0 = vpop.f32.mrb[41].mxu1  ;;  %v2030_v1 = vmul.f32 %v2025_v58, %v2025_v58 }
 0x88a   : > { %v1973_v2 = vpop.f32.mrb[42].mxu1  ;;  %v3093_v0 = vld [vmem:[%s3507_s20] sm:$0xff]  }
 0x88b   : > { %v2026_v3 = vsub.f32 %v3848_v30, %v2022_v63  ;;  %v2940_v4 = vpop.f32.mrb[43].mxu1  ;;  %v2036_v5 = vsel %vm1373_vm6, %v2030_v1, 0.0  ;;  %v3094_v1 = vld [vmem:[%s3512_s4] sm:$0xff]   ;;  %2956 = vmatpush3.bf16.msra.mxu0 %v3093_v0  ;;  %v3095_v2 = vld [vmem:[%s3507_s20 + $0x8] sm:$0xff]  }
 0x88c   : > { %v2013_v25 = vpop.f32.mrb[28].mxu0  ;;  %2037 = vadd.xlane.f32.xlu0 %v2036_v5  ;;  %2957 = vmatprep.subr.bf16.mxu0 %v3273_v6 }
 0x88d   : > { %v2023_v7 = vmul.f32 %v2019_v24, %v2013_v25  ;;  %v2945_v8 = vpop.f32.mrb[29].mxu0  ;;  %v2031_v19 = vmul.f32 %v2026_v3, %v2026_v3 }
 0x88e   : > { %v2016_v9 = vpop.f32.mrb[30].mxu0  ;;  %v2736_v8 = vld [vmem:[%s700_s15] ss:$0 sm:$0xff] }
 0x88f   : > { %v2027_v10 = vsub.f32 %v3850_v33, %v2023_v7  ;;  %v2946_v46 = vpop.f32.mrb[31].mxu0  ;;  %v2039_v35 = vsel %vm1373_vm6, %v2031_v19, 0.0  ;;  %2958 = vmatpush3.bf16.msra.mxu0 %v3095_v2 }
 0x890   : > { %2040 = vadd.xlane.f32.xlu1 %v2039_v35  ;;  %2971 = vmatprep.subr.bf16.mxu0 %v3273_v6  ;;  %v3097_v35 = vld [vmem:[%s3518_s14] sm:$0xff]  }
 0x891   : > { %v2032_v12 = vmul.f32 %v2027_v10, %v2027_v10 }
 0x893   : > { %v2042_v30 = vsel %vm1373_vm6, %v2032_v12, 0.0  ;;  %v3099_v12 = vld [vmem:[%s3518_s14 + $0x10] sm:$0xff]  }
 0x894   : > { %2043 = vadd.xlane.f32.xlu0 %v2042_v30  ;;  %2034 = vadd.xlane.f32.xlu1 %v2033_v13  ;;  %v3100_v30 = vld [vmem:[%s3518_s14 + $0x18] sm:$0xff]   ;;  %v3101_v13 = vld [vmem:[%s3518_s14 + $0x20] sm:$0xff]  }
 0x919   : > { %v2038_v14 = vpop.xlane.xlu0 %2037 }
 0x91a   : > { %v2047_v62 = vmul.f32 0.125, %v2038_v14  ;;  %v3102_v14 = vld [vmem:[%s3518_s14 + $0x28] sm:$0xff]  }
 0x91c   : > { %v2051_v15 = vadd.f32 1e-06, %v2047_v62  ;;  %v3103_v62 = vld [vmem:[%s3518_s14 + $0x30] sm:$0xff]  }
 0x91d   : > { %v2041_v16 = vpop.xlane.xlu1 %2040 }
 0x91e   : > { %3139 = vrsqrt.f32 %v2051_v15  ;;  %v2048_v33 = vmul.f32 0.125, %v2041_v16  ;;  %v3104_v15 = vld [vmem:[%s3518_s14 + $0x38] sm:$0xff]  }
 0x920   : > { %v2052_v17 = vadd.f32 1e-06, %v2048_v33 }
 0x921   : > { %v2044_v39 = vpop.xlane.xlu0 %2043  ;;  %v2035_v51 = vpop.xlane.xlu1 %2034 }
 0x922   : > { %3141 = vrsqrt.f32 %v2052_v17  ;;  %v2049_v18 = vmul.f32 0.125, %v2044_v39  ;;  %v2046_v21 = vmul.f32 0.125, %v2035_v51 }
 0x924   : > { %v2053_v45 = vadd.f32 1e-06, %v2049_v18  ;;  %v2050_v20 = vadd.f32 1e-06, %v2046_v21 }
 0x926   : > { %3143 = vrsqrt.f32 %v2053_v45 }
 0x927   : > { %3145 = vrsqrt.f32 %v2050_v20 }
 0x928   : > { %v3140_v23 = vpop.eup %3139 }
 0x929   : > { %v2059_v26 = vmul.f32 %v3140_v23, %v2025_v58 }
 0x92b   : > { %v2069_v29 = vmul.f32 %v2729_v49, %v2059_v26 }
 0x92c   : > { %v3142_v31 = vpop.eup %3141 }
 0x92d   : > { %v2764_v22 = vpack.c.bf16 %v2069_v29, %v2069_v29  ;;  %v2060_v34 = vmul.f32 %v3142_v31, %v2026_v3  ;;  %v3096_v3 = vld [vmem:[%s3512_s4 + $0x8] sm:$0xff]  }
 0x92f   : > { %2081 = vrot.lane.b32.xlu0 %v2764_v22, %s3285_s28  ;;  %v2070_v37 = vmul.f32 %v2729_v49, %v2060_v34 }
 0x930   : > { %v3144_v36 = vpop.eup %3143 }
 0x931   : > { %v3146_v40 = vpop.eup %3145  ;;  %v2765_v41 = vpack.c.bf16 %v2070_v37, %v2070_v37  ;;  %v2061_v42 = vmul.f32 %v3144_v36, %v2027_v10 }
 0x932   : > { %v2058_v43 = vmul.f32 %v3146_v40, %v3884_v55  ;;  %v2163_v55 = vstv %s2162_s29 }
 0x933   : > { %2089 = vrot.lane.b32.xlu1 %v2765_v41, %s3286_s30  ;;  %v2071_v28 = vmul.f32 %v2729_v49, %v2061_v42 }
 0x934   : > { %v2068_v38 = vmul.f32 %v2729_v49, %v2058_v43 }
 0x935   : > { %v2766_v44 = vpack.c.bf16 %v2071_v28, %v2071_v28 }
 0x936   : > { %v2072_v24 = vpack.c.bf16 %v2068_v38, %v2068_v38 }
 0x937   : > { %2097 = vrot.lane.b32.xlu1 %v2766_v44, %s3287_s24 }
 0x938   : > { %2077 = vst.msk [vmem:[#allocation3] sm:$0xf] %vm2076_vm7, %v2072_v24  ;;  %v2753_v24 = vld [vmem:[%s4077_s23] ss:$0 sm:$0xff] (%p2419_p12) }
 0x9a1   : > { %v2082_v47 = vpop.permute.xlu0 %2081 }
 0x9a2   : > { %2085 = vst.msk [vmem:[#allocation3] sm:$0xf] %vm2084_vm8, %v2082_v47 }
 0x9a5   : > { %v2090_v48 = vpop.permute.xlu1 %2089 }
 0x9a6   : > { %2093 = vst.msk [vmem:[#allocation3] sm:$0xf] %vm2092_vm9, %v2090_v48 }
 0x9a9   : > { %v2098_v50 = vpop.permute.xlu1 %2097 }
 0x9aa   : > { %2101 = vst.msk [vmem:[#allocation3] sm:$0xf] %vm2100_vm10, %v2098_v50 }
 0x9b1   : > { %v2102_v52 = vld [vmem:[#allocation3] sm:$0xf] }
 0x9b2   : > { %2952 = vmatmul.mubr.msk.bf16.vlgmr.msra.gmra.mrb[44].mxu1 %vm751_vm1, %v2102_v52 }
 0x9b3   : > { %2967 = vmatprep.mubr.msk.bf16.mxu1 %vm3274_vm2, %v3273_v6  ;;  %2964 = vmatpush3.bf16.msra.mxu1 %v3094_v1 }
 0x9b4   : > { %2965 = vmatprep.subr.bf16.mxu1 %v3273_v6 }
 0x9b7   : > { %2966 = vmatpush3.bf16.msra.mxu1 %v3096_v3 }
 0xa85   : > { %v2156_v53 = vpop.f32.mrb[44].mxu1 }
 0xa86   : > { %v2164_v54 = vmul.f32 %v2163_v55, %v2156_v53  ;;  %v2953_v56 = vpop.f32.mrb[45].mxu1 }
 0xa87   : > { %v2159_v59 = vpop.f32.mrb[46].mxu1 }
 0xa88   : > { %v2165_v58 = vadd.f32 %v3153_v57, %v2164_v54  ;;  %v2954_v61 = vpop.f32.mrb[47].mxu1 }
 0xa8a   : > { %2166 = vst.msk [vmem:[%s3520_s19] sm:$0xff] %vm751_vm1, %v2165_v58  ;;  %v2168_v60 = vmul.f32 %v2165_v58, %v2165_v58 }
 0xa8c   : > { %v2169_v63 = vsel %vm751_vm1, %v2168_v60, 0.0 }
 0xa8d   : > { %2170 = vadd.xlane.f32.xlu0 %v2169_v63 }
 0xa91   : > { %v2416_v32 = vld [vmem:[%s3520_s19] sm:$0xff] }
 0xb1a   : > { %v2171_v4 = vpop.xlane.xlu0 %2170 }
 0xb1b   : > { %v2172_v5 = vmul.f32 0.03125, %v2171_v4 }
 0xb1d   : > { %v2173_v25 = vadd.f32 1e-06, %v2172_v5 }
 0xb1f   : > { %3147 = vrsqrt.f32 %v2173_v25 }
 0xb29   : > { %v3148_v7 = vpop.eup %3147 }
 0xb2a   : > { %v2175_v19 = vmul.f32 %v3148_v7, %v2165_v58 }
 0xb2c   : > { %v2182_v9 = vmul.f32 %v2736_v8, %v2175_v19 }
 0xb2e   : > { %v2183_v10 = vpack.c.bf16 %v2182_v9, %v2182_v9 }
 0xb30   : > { %2185 = vst.msk [vmem:[#allocation2] sm:$0xf] %vm2184_vm11, %v2183_v10 }
 0xb37   : > { %v2186_v46 = vld [vmem:[#allocation2] sm:$0xf] }
 0xb38   : > { %2960 = vmatmul.mubr.msk.bf16.vlgmr.msra.gmra.mrb[32].mxu0 %vm751_vm1, %v2186_v46  ;;  %2968 = vmatmul.mubr.msk.bf16.vlgmr.msra.gmra.mrb[48].mxu1 %vm751_vm1, %v2186_v46 }
 0xb39   : > { %2987 = vmatprep.mubr.msk.bf16.mxu0 %vm3274_vm2, %v3273_v6  ;;  %2972 = vmatpush3.bf16.msra.mxu0 %v3097_v35 }
 0xb3a   : > { %2973 = vmatprep.subr.bf16.mxu0 %v3273_v6 }
 0xb3d   : > { %2974 = vmatpush3.bf16.msra.mxu0 %v3098_v11 }
 0xb3e   : > { %2975 = vmatprep.subr.bf16.mxu0 %v3273_v6 }
 0xb41   : > { %2976 = vmatpush3.bf16.msra.mxu0 %v3099_v12 }
 0xb42   : > { %2977 = vmatprep.subr.bf16.mxu0 %v3273_v6 }
 0xb45   : > { %2978 = vmatpush3.bf16.msra.mxu0 %v3100_v30 }
 0xb46   : > { %2979 = vmatprep.subr.bf16.mxu0 %v3273_v6 }
 0xb49   : > { %2980 = vmatpush3.bf16.msra.mxu0 %v3101_v13 }
 0xb4a   : > { %2981 = vmatprep.subr.bf16.mxu0 %v3273_v6 }
 0xb4d   : > { %2982 = vmatpush3.bf16.msra.mxu0 %v3102_v14 }
 0xb4e   : > { %2983 = vmatprep.subr.bf16.mxu0 %v3273_v6 }
 0xb51   : > { %2984 = vmatpush3.bf16.msra.mxu0 %v3103_v62 }
 0xb52   : > { %2985 = vmatprep.subr.bf16.mxu0 %v3273_v6 }
 0xb55   : > { %2986 = vmatpush3.bf16.msra.mxu0 %v3104_v15 }
 0xc0b   : > { %v2241_v16 = vpop.f32.mrb[32].mxu0  ;;  %v2297_v33 = vpop.f32.mrb[48].mxu1 }
 0xc0c   : > { %v2743_v17 = vmul.f32 -1.442695, %v2241_v16  ;;  %v2961_v39 = vpop.f32.mrb[33].mxu0  ;;  %v2969_v51 = vpop.f32.mrb[49].mxu1 }
 0xc0d   : > { %v2244_v18 = vpop.f32.mrb[34].mxu0  ;;  %v2300_v21 = vpop.f32.mrb[50].mxu1 }
 0xc0e   : > { %3149 = vpow2.f32 %v2743_v17  ;;  %v2962_v45 = vpop.f32.mrb[35].mxu0  ;;  %v2970_v20 = vpop.f32.mrb[51].mxu1 }
 0xc18   : > { %v3150_v23 = vpop.eup %3149 }
 0xc19   : > { %v2306_v49 = vadd.f32 1.0, %v3150_v23 }
 0xc1b   : > { %3151 = vrcp.f32 %v2306_v49 }
 0xc25   : > { %v3152_v26 = vpop.eup %3151 }
 0xc26   : > { %v2309_v6 = vmul.f32 %v3152_v26, %v2241_v16 }
 0xc28   : > { %v2310_v27 = vmul.f32 %v2309_v6, %v2297_v33 }
 0xc2a   : > { %v2311_v29 = vpack.c.bf16 %v2310_v27, %v2310_v27 }
 0xc2c   : > { %2988 = vmatmul.mubr.bf16.vlgmr.msra.gmra.mrb[36].mxu0 %v2311_v29 }
 0xcfc   : > { %2423 = sbr.rel (!%p2419_p12) target bundleno = 3503 (0xdaf), region = 92 }
 0xcff   : > { %v2410_v31 = vpop.f32.mrb[36].mxu0 }
 0xd00   : > { %v2417_v22 = vadd.f32 %v2416_v32, %v2410_v31  ;;  %v2989_v34 = vpop.f32.mrb[37].mxu0 }
 0xd01   : > { %v2413_v37 = vpop.f32.mrb[38].mxu0 }
 0xd02   : > { %2418 = vst.msk [vmem:[%s3520_s19] sm:$0xff] %vm751_vm1, %v2417_v22  ;;  %v2990_v36 = vpop.f32.mrb[39].mxu0 }
 0xd09   : > { %v2424_v40 = vld [vmem:[%s3520_s19] sm:$0xff] }
 0xd0a   : > { %v2426_v41 = vmul.f32 %v2424_v40, %v2424_v40 }
 0xd0c   : > { %v2427_v42 = vsel %vm751_vm1, %v2426_v41, 0.0 }
 0xd0d   : > { %2428 = vadd.xlane.f32.xlu0 %v2427_v42 }
 0xd9a   : > { %v2429_v43 = vpop.xlane.xlu0 %2428 }
 0xd9b   : > { %v2431_v28 = vmul.f32 0.03125, %v2429_v43 }
 0xd9d   : > { %v2432_v38 = vadd.f32 1e-06, %v2431_v28 }
 0xd9f   : > { %3154 = vrsqrt.f32 %v2432_v38 }
 0xda9   : > { %v3155_v44 = vpop.eup %3154 }
 0xdaa   : > { %v2434_v47 = vmul.f32 %v3155_v44, %v2424_v40 }
 0xdac   : > { %v2441_v48 = vmul.f32 %v2753_v24, %v2434_v47 }
 0xdae   : > { %2442 = vst.msk [vmem:[%s3520_s19] sm:$0xff] %vm751_vm1, %v2441_v48 }
 0xdaf PF: > { %s4078_s20 = sld [smem:[#allocation14_spill]]  ;;  %s4079_s14 = sld [smem:[#allocation11_spill]] }
 0xdb0   : > { %s4081_s17 = sld [smem:[#allocation30_spill]]  ;;  %s2457_s27 = sshll.u32 %s3520_s19, 4  ;;  %s2458_s27 = int_to_ptr.vmem [resolvable:$true] %s2457_s27 }
 0xdb1   : > { %s3171_s28 = scalar_lea.vmem %s2458_s27, 128  ;;  %s3288_s30 = smov [#allocation7]  }
 0xdb2   : > { %p3172_p13 = scmp.ne.s32.totalorder %s2458_s27, %s3171_s28  ;;  %s3175_s24 = sshll.u32 %s3288_s30, 4  ;;  %s3176_s24 = int_to_ptr.vmem [resolvable:$false] %s3175_s24 }
 0xdb3   : > { %s3177_s22 = scalar_lea.vmem %s3176_s24, 256  ;;  %p3178_p2 = scmp.lt.s32.totalorder %s2458_s27, %s3176_s24 }
 0xdb4   : > { %p3173_p0 = pnand %p3172_p13, %p3414_p3  ;;  %p3179_p4 = scmp.lt.s32.totalorder %s3177_s22, %s3171_s28 }
 0xdb5   : > { %s2755_s7 = sshll.u32 %s4078_s20, 7  ;;  %s4083_s13 = sand.u32 1, %s4079_s14  }
 0xdb6   : > { %s4082_s21 = smov %s4081_s17  ;;  %s3960_s18 = scalar_lea.hbm %s4081_s17, %s2755_s7 }
 0xdb7   : > { %s2444_s16 = scalar_lea.sflag [#allocation5], %s4083_s13  ;;  %p3174_p1 = pneg %p3173_p0 }
 0xdb8   : > { %p3180_p5 = por %p3179_p4, %p3178_p2 }
 0xdba   : > { %p3181_p6 = pnand %p3180_p5, %p3174_p1 }
 0xdbc   : > { %3184 = shalt.err (!%p3181_p6)
}
 0xdbd   : > { %s3185_s19 = scalar_lea.hbm %s3960_s18, 128  ;;  %s3189_s26 = scalar_lea.hbm %s4082_s21, 256 }
 0xdbe   : > { %p3186_p7 = scmp.ne.s32.totalorder %s3960_s18, %s3185_s19  ;;  %p3190_p11 = scmp.lt.u32.totalorder %s3960_s18, %s4082_s21 }
 0xdbf   : > { %p3191_p10 = scmp.lt.u32.totalorder %s3189_s26, %s3185_s19  ;;  %p3193_p13 = scmp.lt.u32.totalorder %s3185_s19, %s3960_s18 }
 0xdc0   : > { %p3187_p8 = pnand %p3186_p7, %p3414_p3 }
 0xdc1   : > { %p3192_p12 = por %p3191_p10, %p3190_p11 }
 0xdc2   : > { %p3188_p9 = pneg %p3187_p8 }
 0xdc3   : > { %p3194_p0 = por %p3193_p13, %p3192_p12 }
 0xdc5   : > { %p3195_p1 = pnand %p3194_p0, %p3188_p9 }
 0xdc7   : > { %3198 = shalt.err (!%p3195_p1)
}
 0xdc8   : > { %2995 = dma.vmem_to_hbm [thread:$0]  (%p3414_p3), %s2458_s27, 128, %s3960_s18, %s2444_s16  }
 0xdc9 PF: > { %s4084_s15 = sld [smem:[#allocation17_spill]]  ;;  %s4085_s23 = sld [smem:[#allocation10_spill]] }
 0xdca   : > { %s4086_s20 = sld [smem:[#allocation21_spill]] }
 0xdcf   : > { %p3007_p2 = scmp.ge.s32.totalorder %s4084_s15, 2  ;;  %s2469_s14 = sand.u32 1, %s4085_s23  }
 0xdd0   : > { %p4087_p4 = scmp.ne.s32.totalorder %s4086_s20, 0  ;;  %s2470_s7 = scalar_lea.sflag [#allocation5], %s2469_s14 }
 0xdd2   : > { %p3002_p5 = pnand %p3007_p2, %p4087_p4 }
 0xdd4   : > { %3236 = dma.done.wait (!%p3002_p5), %s2470_s7, 128  }
 0xdd5   : > { %3238 = vsyncadd (!%p3002_p5), %s2470_s7, 4294967168  ;;  %s28_s20 = sadd.s32 1, %s4084_s15   ;;  %s4088_s29 = sld [smem:[#allocation11_spill]] }
 0xdd6   : > { %p25_p6 = scmp.ge.s32.totalorder %s28_s20, 6   ;;  %s4089_s30 = sld [smem:[#allocation12_spill]] }
 0xdd7   : > { %s4090_s15 = sld [smem:[#allocation22_spill]]  ;;  %s4091_s16 = sld [smem:[#allocation15_spill]] }
 0xdd8   : > { %s4092_s17 = sld [smem:[#allocation16_spill]]  ;;  %s4093_s18 = sld [smem:[#allocation18_spill]] }
 0xdd9   : > { %s4094_s19 = sld [smem:[#allocation20_spill]]  ;;  %27 = sbr.rel (!%p25_p6) target bundleno = 15 (0xf), region = 161 }
 0xde0   :  { %2475 = vsyncpa [#allocation5], 1 }
 0xde1   :  { %2477 = vsyncpa [#allocation5 + $0x1], 1 }
 0xde2   :  { %2478 = vsyncpa [#allocation6], 1 }
 0xde3   :  { %2480 = vsyncpa [#allocation6 + $0x1], 1 }

</bundles_post_ra>
